<compile_context>
chip_gen: v5e
topology: v5e:2x2
jax: 0.10.0
libtpu: 0.0.40
codegen_flags: <defaults>
</compile_context>

<pallas_src>
import numpy as np
import jax
import jax.numpy as jnp
from jax.experimental import pallas as pl
from jax.experimental.pallas import tpu as pltpu


# --------------------------------------------------------------------------
# Pallas kernel
# --------------------------------------------------------------------------
def _rpn_head_kernel(x_ref, w9_ref, bconv_ref, whT_ref, bh_ref, out_ref, col_ref):
    """One batch element of RPNHead.

    x_ref    : (1, H, W, C) f32   NHWC feature map (unpadded)
    w9_ref   : (9*C, C)     bf16  3x3 conv weights, row = (dy*3+dx)*C + cin
    bconv_ref: (1, C)       f32
    whT_ref  : (5A, C)      f32   fused [cls ; bbox] 1x1 weights, transposed
    bh_ref   : (5A, 1)      f32   fused [cls ; bbox] biases
    out_ref  : (1, 5A, H*W) f32   fused head output, channel-major (lane-dense)
    col_ref  : (H, W, 9*C)  f32   im2col scratch
    """
    _, H, W, C = x_ref.shape

    # Zero the scratch: only the halo regions (the conv's zero padding) rely on
    # it; every valid region is overwritten below.  Re-zeroed every grid step
    # so megacore-split grid iterations stay independent.
    col_ref[...] = jnp.zeros_like(col_ref)

    # im2col: column block k = dy*3 + dx holds the input shifted by (dy-1, dx-1)
    # with zeros at the borders -- identical to nn.Conv2d(C, C, 3, 1, padding=1).
    for dy in range(3):
        for dx in range(3):
            k = dy * 3 + dx
            h0, h1 = max(0, 1 - dy), H - max(0, dy - 1)
            w0, w1 = max(0, 1 - dx), W - max(0, dx - 1)
            col_ref[h0:h1, w0:w1, k * C:(k + 1) * C] = (
                x_ref[0, h0 + dy - 1:h1 + dy - 1, w0 + dx - 1:w1 + dx - 1, :])

    # 3x3 conv as a single K = 9*C matmul (bf16 operands, f32 accumulation).
    col = col_ref[...].reshape(H * W, 9 * C).astype(jnp.bfloat16)
    t = jnp.dot(col, w9_ref[...], preferred_element_type=jnp.float32)
    t = jnp.maximum(t + bconv_ref[...], 0.0)               # bias + ReLU in f32

    # Fused cls+bbox 1x1 heads in "A @ B^T" form: (5A, C) . (H*W, C)^T
    # -> (5A, H*W), so the store is lane-dense (last dim = H*W).
    head = jax.lax.dot_general(
        whT_ref[...], t,
        dimension_numbers=(((1,), (1,)), ((), ())),
        preferred_element_type=jnp.float32)
    out_ref[0] = head + bh_ref[...]


# --------------------------------------------------------------------------
# Wrapper (pallas_call plumbing)
# --------------------------------------------------------------------------
def prepare_rpn_head_params(params):
    """One-time conversion of module-layout params into kernel layout."""
    C = params["conv_b"].shape[0]
    A = params["cls_b"].shape[0]
    return {
        "w9": params["conv_w9"].astype(jnp.bfloat16),                 # (9C, C)
        "conv_b": params["conv_b"].reshape(1, C),                     # (1, C)
        "head_wT": jnp.concatenate([params["cls_w"], params["reg_w"]],
                                   axis=1).T,                         # (5A, C)
        "head_b": jnp.concatenate([params["cls_b"], params["reg_b"]]
                                  ).reshape(5 * A, 1),                # (5A, 1)
    }


@jax.jit
def rpn_head_forward(x_nchw, kp):
    """RPNHead.forward: x (B,C,H,W) -> (cls (B,A,H,W), reg (B,4A,H,W))."""
    B, C, H, W = x_nchw.shape
    A5 = kp["head_wT"].shape[0]
    A = A5 // 5
    x_nhwc = jnp.transpose(x_nchw, (0, 2, 3, 1))      # NCHW -> NHWC (lanes = C)

    head = pl.pallas_call(
        _rpn_head_kernel,
        out_shape=jax.ShapeDtypeStruct((B, A5, H * W), jnp.float32),
        grid=(B,),
        in_specs=[
            pl.BlockSpec((1, H, W, C), lambda b: (b, 0, 0, 0)),
            pl.BlockSpec((9 * C, C), lambda b: (0, 0)),
            pl.BlockSpec((1, C), lambda b: (0, 0)),
            pl.BlockSpec((A5, C), lambda b: (0, 0)),
            pl.BlockSpec((A5, 1), lambda b: (0, 0)),
        ],
        out_specs=pl.BlockSpec((1, A5, H * W), lambda b: (b, 0, 0)),
        scratch_shapes=[pltpu.VMEM((H, W, 9 * C), jnp.float32)],
        compiler_params=pltpu.CompilerParams(
            dimension_semantics=("parallel",)),
    )(x_nhwc, kp["w9"], kp["conv_b"], kp["head_wT"], kp["head_b"])

    head = head.reshape(B, A5, H, W)                   # cheap XLA reshape
    cls = head[:, :A]                                  # (B, A, H, W)   NCHW
    reg = head[:, A:]                                  # (B, 4A, H, W)  NCHW
    return cls, reg


# --------------------------------------------------------------------------
# Parameter init (RPNHead.__init__: normal std=0.01 weights, zero bias)
# --------------------------------------------------------------------------
def init_rpn_head_params(key, in_channels, num_anchors):
    k1, k2, k3 = jax.random.split(key, 3)
    std = 0.01
    conv_w = std * jax.random.normal(
        k1, (3, 3, in_channels, in_channels), jnp.float32)      # HWIO
    cls_w = std * jax.random.normal(
        k2, (in_channels, num_anchors), jnp.float32)
    reg_w = std * jax.random.normal(
        k3, (in_channels, num_anchors * 4), jnp.float32)
    return {
        "conv_w9": conv_w.reshape(9 * in_channels, in_channels),  # (9C, C)
        "conv_b": jnp.zeros((in_channels,), jnp.float32),
        "cls_w": cls_w,
        "cls_b": jnp.zeros((num_anchors,), jnp.float32),
        "reg_w": reg_w,
        "reg_b": jnp.zeros((num_anchors * 4,), jnp.float32),
    }


# --------------------------------------------------------------------------
# Pure-JAX reference for correctness checking
# --------------------------------------------------------------------------
def ref_rpn_head(x_nchw, params):
    C = x_nchw.shape[1]
    w_hwio = params["conv_w9"].reshape(3, 3, C, C)
    w_oihw = jnp.transpose(w_hwio, (3, 2, 0, 1))
    t = jax.lax.conv_general_dilated(
        x_nchw, w_oihw, window_strides=(1, 1), padding=((1, 1), (1, 1)),
        dimension_numbers=("NCHW", "OIHW", "NCHW"),
        precision=jax.lax.Precision.HIGHEST)
    t = jax.nn.relu(t + params["conv_b"][None, :, None, None])
    cls = jnp.einsum("nchw,ca->nahw", t, params["cls_w"],
                     precision=jax.lax.Precision.HIGHEST) \
        + params["cls_b"][None, :, None, None]
    reg = jnp.einsum("nchw,cr->nrhw", t, params["reg_w"],
                     precision=jax.lax.Precision.HIGHEST) \
        + params["reg_b"][None, :, None, None]
    return cls, reg


# --------------------------------------------------------------------------
# Main
# --------------------------------------------------------------------------
if __name__ == "__main__":
    key = jax.random.PRNGKey(0)
    kparam, kx0, kx1 = jax.random.split(key, 3)

    C, A, B = 32, 3, 2
    params = init_rpn_head_params(kparam, C, A)
    kparams = prepare_rpn_head_params(params)

    # Two FPN-style feature maps (the module is applied once per level).
    xs = [
        jax.random.normal(kx0, (B, C, 16, 16), jnp.float32),
        jax.random.normal(kx1, (B, C, 8, 8), jnp.float32),
    ]

    outs = [rpn_head_forward(x, kparams) for x in xs]
    jax.block_until_ready(outs)

    # Correctness check against pure-JAX reference (bf16 MXU inputs -> loose rtol).
    for x, (cls, reg) in zip(xs, outs):
        ref_cls, ref_reg = ref_rpn_head(x, params)
        np.testing.assert_allclose(np.asarray(cls), np.asarray(ref_cls),
                                   rtol=5e-2, atol=2e-3)
        np.testing.assert_allclose(np.asarray(reg), np.asarray(ref_reg),
                                   rtol=5e-2, atol=2e-3)
        assert cls.shape == (B, A, x.shape[2], x.shape[3])
        assert reg.shape == (B, 4 * A, x.shape[2], x.shape[3])

    print("KERNEL_OK")
</pallas_src>

<mosaic_0001>
module attributes {stable_mosaic.version = 11 : i64} {
  func.func @_rpn_head_kernel(%arg0: i32, %arg1: memref<1x16x16x32xf32, #tpu.memory_space<vmem>>, %arg2: memref<288x32xbf16, #tpu.memory_space<vmem>>, %arg3: memref<1x32xf32, #tpu.memory_space<vmem>>, %arg4: memref<15x32xf32, #tpu.memory_space<vmem>>, %arg5: memref<15x1xf32, #tpu.memory_space<vmem>>, %arg6: memref<1x15x256xf32, #tpu.memory_space<vmem>>, %arg7: memref<16x16x288xf32, #tpu.memory_space<vmem>>) attributes {dimension_semantics = [#tpu.dimension_semantics<parallel>], iteration_bounds = array<i64: 2>, scalar_prefetch = 0 : i64, scratch_operands = 1 : i64, tpu.core_type = #tpu.core_type<tc>, window_params = [{transform_indices = @transform_0, window_bounds = array<i64: 1, 16, 16, 32>}, {pipeline_mode = #tpu.pipeline_mode<synchronous>, transform_indices = @transform_1, window_bounds = array<i64: 288, 32>}, {pipeline_mode = #tpu.pipeline_mode<synchronous>, transform_indices = @transform_2, window_bounds = array<i64: 1, 32>}, {pipeline_mode = #tpu.pipeline_mode<synchronous>, transform_indices = @transform_3, window_bounds = array<i64: 15, 32>}, {pipeline_mode = #tpu.pipeline_mode<synchronous>, transform_indices = @transform_4, window_bounds = array<i64: 15, 1>}, {transform_indices = @transform_5, window_bounds = array<i64: 1, 15, 256>}]} {
    %cst = arith.constant 0.000000e+00 : f32
    %0 = vector.broadcast %cst : f32 to vector<16x16x288xf32>
    %c0 = arith.constant 0 : index
    %c0_0 = arith.constant 0 : index
    %c0_1 = arith.constant 0 : index
    %1 = vector.load %arg7[%c0, %c0_0, %c0_1] : memref<16x16x288xf32, #tpu.memory_space<vmem>>, vector<16x16x288xf32>
    tpu.vector_store %arg7[%c0, %c0_0, %c0_1], %0 {strides = array<i32>} : memref<16x16x288xf32, #tpu.memory_space<vmem>>, vector<16x16x288xf32>,
    %c0_2 = arith.constant 0 : index
    %c0_3 = arith.constant 0 : index
    %c0_4 = arith.constant 0 : index
    %c0_5 = arith.constant 0 : index
    %2 = vector.load %arg1[%c0_2, %c0_3, %c0_4, %c0_5] : memref<1x16x16x32xf32, #tpu.memory_space<vmem>>, vector<1x15x15x32xf32>
    %3 = vector.shape_cast %2 : vector<1x15x15x32xf32> to vector<15x15x32xf32>
    %c1 = arith.constant 1 : index
    %c1_6 = arith.constant 1 : index
    %c0_7 = arith.constant 0 : index
    %4 = vector.load %arg7[%c1, %c1_6, %c0_7] : memref<16x16x288xf32, #tpu.memory_space<vmem>>, vector<15x15x32xf32>
    tpu.vector_store %arg7[%c1, %c1_6, %c0_7], %3 {strides = array<i32>} : memref<16x16x288xf32, #tpu.memory_space<vmem>>, vector<15x15x32xf32>,
    %c0_8 = arith.constant 0 : index
    %c0_9 = arith.constant 0 : index
    %c0_10 = arith.constant 0 : index
    %c0_11 = arith.constant 0 : index
    %5 = vector.load %arg1[%c0_8, %c0_9, %c0_10, %c0_11] : memref<1x16x16x32xf32, #tpu.memory_space<vmem>>, vector<1x15x16x32xf32>
    %6 = vector.shape_cast %5 : vector<1x15x16x32xf32> to vector<15x16x32xf32>
    %c1_12 = arith.constant 1 : index
    %c0_13 = arith.constant 0 : index
    %c32 = arith.constant 32 : index
    %7 = vector.load %arg7[%c1_12, %c0_13, %c32] : memref<16x16x288xf32, #tpu.memory_space<vmem>>, vector<15x16x32xf32>
    tpu.vector_store %arg7[%c1_12, %c0_13, %c32], %6 {strides = array<i32>} : memref<16x16x288xf32, #tpu.memory_space<vmem>>, vector<15x16x32xf32>,
    %c0_14 = arith.constant 0 : index
    %c0_15 = arith.constant 0 : index
    %c1_16 = arith.constant 1 : index
    %c0_17 = arith.constant 0 : index
    %8 = vector.load %arg1[%c0_14, %c0_15, %c1_16, %c0_17] : memref<1x16x16x32xf32, #tpu.memory_space<vmem>>, vector<1x15x15x32xf32>
    %9 = vector.shape_cast %8 : vector<1x15x15x32xf32> to vector<15x15x32xf32>
    %c1_18 = arith.constant 1 : index
    %c0_19 = arith.constant 0 : index
    %c64 = arith.constant 64 : index
    %10 = vector.load %arg7[%c1_18, %c0_19, %c64] : memref<16x16x288xf32, #tpu.memory_space<vmem>>, vector<15x15x32xf32>
    tpu.vector_store %arg7[%c1_18, %c0_19, %c64], %9 {strides = array<i32>} : memref<16x16x288xf32, #tpu.memory_space<vmem>>, vector<15x15x32xf32>,
    %c0_20 = arith.constant 0 : index
    %c0_21 = arith.constant 0 : index
    %c0_22 = arith.constant 0 : index
    %c0_23 = arith.constant 0 : index
    %11 = vector.load %arg1[%c0_20, %c0_21, %c0_22, %c0_23] : memref<1x16x16x32xf32, #tpu.memory_space<vmem>>, vector<1x16x15x32xf32>
    %12 = vector.shape_cast %11 : vector<1x16x15x32xf32> to vector<16x15x32xf32>
    %c0_24 = arith.constant 0 : index
    %c1_25 = arith.constant 1 : index
    %c96 = arith.constant 96 : index
    %13 = vector.load %arg7[%c0_24, %c1_25, %c96] : memref<16x16x288xf32, #tpu.memory_space<vmem>>, vector<16x15x32xf32>
    tpu.vector_store %arg7[%c0_24, %c1_25, %c96], %12 {strides = array<i32>} : memref<16x16x288xf32, #tpu.memory_space<vmem>>, vector<16x15x32xf32>,
    %c0_26 = arith.constant 0 : index
    %c0_27 = arith.constant 0 : index
    %c0_28 = arith.constant 0 : index
    %c0_29 = arith.constant 0 : index
    %14 = vector.load %arg1[%c0_26, %c0_27, %c0_28, %c0_29] : memref<1x16x16x32xf32, #tpu.memory_space<vmem>>, vector<1x16x16x32xf32>
    %15 = vector.shape_cast %14 : vector<1x16x16x32xf32> to vector<16x16x32xf32>
    %c0_30 = arith.constant 0 : index
    %c0_31 = arith.constant 0 : index
    %c128 = arith.constant 128 : index
    %16 = vector.load %arg7[%c0_30, %c0_31, %c128] : memref<16x16x288xf32, #tpu.memory_space<vmem>>, vector<16x16x32xf32>
    tpu.vector_store %arg7[%c0_30, %c0_31, %c128], %15 {strides = array<i32>} : memref<16x16x288xf32, #tpu.memory_space<vmem>>, vector<16x16x32xf32>,
    %c0_32 = arith.constant 0 : index
    %c0_33 = arith.constant 0 : index
    %c1_34 = arith.constant 1 : index
    %c0_35 = arith.constant 0 : index
    %17 = vector.load %arg1[%c0_32, %c0_33, %c1_34, %c0_35] : memref<1x16x16x32xf32, #tpu.memory_space<vmem>>, vector<1x16x15x32xf32>
    %18 = vector.shape_cast %17 : vector<1x16x15x32xf32> to vector<16x15x32xf32>
    %c0_36 = arith.constant 0 : index
    %c0_37 = arith.constant 0 : index
    %c160 = arith.constant 160 : index
    %19 = vector.load %arg7[%c0_36, %c0_37, %c160] : memref<16x16x288xf32, #tpu.memory_space<vmem>>, vector<16x15x32xf32>
    tpu.vector_store %arg7[%c0_36, %c0_37, %c160], %18 {strides = array<i32>} : memref<16x16x288xf32, #tpu.memory_space<vmem>>, vector<16x15x32xf32>,
    %c0_38 = arith.constant 0 : index
    %c1_39 = arith.constant 1 : index
    %c0_40 = arith.constant 0 : index
    %c0_41 = arith.constant 0 : index
    %20 = vector.load %arg1[%c0_38, %c1_39, %c0_40, %c0_41] : memref<1x16x16x32xf32, #tpu.memory_space<vmem>>, vector<1x15x15x32xf32>
    %21 = vector.shape_cast %20 : vector<1x15x15x32xf32> to vector<15x15x32xf32>
    %c0_42 = arith.constant 0 : index
    %c1_43 = arith.constant 1 : index
    %c192 = arith.constant 192 : index
    %22 = vector.load %arg7[%c0_42, %c1_43, %c192] : memref<16x16x288xf32, #tpu.memory_space<vmem>>, vector<15x15x32xf32>
    tpu.vector_store %arg7[%c0_42, %c1_43, %c192], %21 {strides = array<i32>} : memref<16x16x288xf32, #tpu.memory_space<vmem>>, vector<15x15x32xf32>,
    %c0_44 = arith.constant 0 : index
    %c1_45 = arith.constant 1 : index
    %c0_46 = arith.constant 0 : index
    %c0_47 = arith.constant 0 : index
    %23 = vector.load %arg1[%c0_44, %c1_45, %c0_46, %c0_47] : memref<1x16x16x32xf32, #tpu.memory_space<vmem>>, vector<1x15x16x32xf32>
    %24 = vector.shape_cast %23 : vector<1x15x16x32xf32> to vector<15x16x32xf32>
    %c0_48 = arith.constant 0 : index
    %c0_49 = arith.constant 0 : index
    %c224 = arith.constant 224 : index
    %25 = vector.load %arg7[%c0_48, %c0_49, %c224] : memref<16x16x288xf32, #tpu.memory_space<vmem>>, vector<15x16x32xf32>
    tpu.vector_store %arg7[%c0_48, %c0_49, %c224], %24 {strides = array<i32>} : memref<16x16x288xf32, #tpu.memory_space<vmem>>, vector<15x16x32xf32>,
    %c0_50 = arith.constant 0 : index
    %c1_51 = arith.constant 1 : index
    %c1_52 = arith.constant 1 : index
    %c0_53 = arith.constant 0 : index
    %26 = vector.load %arg1[%c0_50, %c1_51, %c1_52, %c0_53] : memref<1x16x16x32xf32, #tpu.memory_space<vmem>>, vector<1x15x15x32xf32>
    %27 = vector.shape_cast %26 : vector<1x15x15x32xf32> to vector<15x15x32xf32>
    %c0_54 = arith.constant 0 : index
    %c0_55 = arith.constant 0 : index
    %c256 = arith.constant 256 : index
    %28 = vector.load %arg7[%c0_54, %c0_55, %c256] : memref<16x16x288xf32, #tpu.memory_space<vmem>>, vector<15x15x32xf32>
    tpu.vector_store %arg7[%c0_54, %c0_55, %c256], %27 {strides = array<i32>} : memref<16x16x288xf32, #tpu.memory_space<vmem>>, vector<15x15x32xf32>,
    %c0_56 = arith.constant 0 : index
    %c0_57 = arith.constant 0 : index
    %c0_58 = arith.constant 0 : index
    %29 = vector.load %arg7[%c0_56, %c0_57, %c0_58] : memref<16x16x288xf32, #tpu.memory_space<vmem>>, vector<16x16x288xf32>
    %30 = vector.shape_cast %29 : vector<16x16x288xf32> to vector<256x288xf32>
    %31 = arith.truncf %30 : vector<256x288xf32> to vector<256x288xbf16>
    %c0_59 = arith.constant 0 : index
    %c0_60 = arith.constant 0 : index
    %32 = vector.load %arg2[%c0_59, %c0_60] : memref<288x32xbf16, #tpu.memory_space<vmem>>, vector<288x32xbf16>
    %cst_61 = arith.constant dense<0.000000e+00> : vector<256x32xf32>
    %33 = tpu.matmul %31, %32, %cst_61 {dimension_numbers = #tpu.dot_dimension_numbers<[1], [0], [0], [1], [0, 0, 1, 1], [], []>} : vector<256x288xbf16>, vector<288x32xbf16>, vector<256x32xf32> -> vector<256x32xf32>
    %c0_62 = arith.constant 0 : index
    %c0_63 = arith.constant 0 : index
    %34 = vector.load %arg3[%c0_62, %c0_63] : memref<1x32xf32, #tpu.memory_space<vmem>>, vector<1x32xf32>
    %35 = vector.broadcast %34 : vector<1x32xf32> to vector<256x32xf32>
    %36 = arith.addf %33, %35 : vector<256x32xf32>
    %cst_64 = arith.constant 0.000000e+00 : f32
    %37 = vector.broadcast %cst_64 : f32 to vector<256x32xf32>
    %38 = arith.maximumf %36, %37 : vector<256x32xf32>
    %c0_65 = arith.constant 0 : index
    %c0_66 = arith.constant 0 : index
    %39 = vector.load %arg4[%c0_65, %c0_66] : memref<15x32xf32, #tpu.memory_space<vmem>>, vector<15x32xf32>
    %cst_67 = arith.constant dense<0.000000e+00> : vector<15x256xf32>
    %40 = tpu.matmul %39, %38, %cst_67 {dimension_numbers = #tpu.dot_dimension_numbers<[1], [1], [0], [0], [0, 0, 1, 0], [], []>} : vector<15x32xf32>, vector<256x32xf32>, vector<15x256xf32> -> vector<15x256xf32>
    %c0_68 = arith.constant 0 : index
    %c0_69 = arith.constant 0 : index
    %41 = vector.load %arg5[%c0_68, %c0_69] : memref<15x1xf32, #tpu.memory_space<vmem>>, vector<15x1xf32>
    %42 = vector.broadcast %41 : vector<15x1xf32> to vector<15x256xf32>
    %43 = arith.addf %40, %42 : vector<15x256xf32>
    %c0_70 = arith.constant 0 : index
    %c0_71 = arith.constant 0 : index
    %c0_72 = arith.constant 0 : index
    %44 = vector.load %arg6[%c0_70, %c0_71, %c0_72] : memref<1x15x256xf32, #tpu.memory_space<vmem>>, vector<1x15x256xf32>
    %45 = vector.shape_cast %44 : vector<1x15x256xf32> to vector<15x256xf32>
    %46 = vector.shape_cast %43 : vector<15x256xf32> to vector<1x15x256xf32>
    tpu.vector_store %arg6[%c0_70, %c0_71, %c0_72], %46 {strides = array<i32>} : memref<1x15x256xf32, #tpu.memory_space<vmem>>, vector<1x15x256xf32>,
    return
  }
  func.func @transform_0(%arg0: i32) -> (i32, i32, i32, i32) {
    %c0_i32 = arith.constant 0 : i32
    %c0_i32_0 = arith.constant 0 : i32
    %c0_i32_1 = arith.constant 0 : i32
    %c0_i32_2 = arith.constant 0 : i32
    return %arg0, %c0_i32, %c0_i32_0, %c0_i32_1 : i32, i32, i32, i32
  }
  func.func @transform_1(%arg0: i32) -> (i32, i32) {
    %c0_i32 = arith.constant 0 : i32
    %c0_i32_0 = arith.constant 0 : i32
    %c0_i32_1 = arith.constant 0 : i32
    return %c0_i32, %c0_i32_0 : i32, i32
  }
  func.func @transform_2(%arg0: i32) -> (i32, i32) {
    %c0_i32 = arith.constant 0 : i32
    %c0_i32_0 = arith.constant 0 : i32
    %c0_i32_1 = arith.constant 0 : i32
    return %c0_i32, %c0_i32_0 : i32, i32
  }
  func.func @transform_3(%arg0: i32) -> (i32, i32) {
    %c0_i32 = arith.constant 0 : i32
    %c0_i32_0 = arith.constant 0 : i32
    %c0_i32_1 = arith.constant 0 : i32
    return %c0_i32, %c0_i32_0 : i32, i32
  }
  func.func @transform_4(%arg0: i32) -> (i32, i32) {
    %c0_i32 = arith.constant 0 : i32
    %c0_i32_0 = arith.constant 0 : i32
    %c0_i32_1 = arith.constant 0 : i32
    return %c0_i32, %c0_i32_0 : i32, i32
  }
  func.func @transform_5(%arg0: i32) -> (i32, i32, i32) {
    %c0_i32 = arith.constant 0 : i32
    %c0_i32_0 = arith.constant 0 : i32
    %c0_i32_1 = arith.constant 0 : i32
    return %arg0, %c0_i32, %c0_i32_0 : i32, i32, i32
  }
}

</mosaic_0001>

<bundles_post_ra>
// kernel: rpn_head_forward.1
= control target key start
LH: loop header
LB: loop body
LE: loop exit
PB: predicated region body
PF: predicated region fallthrough
CT: control target
= control target key end

     0   :  { %10 = vsyncpa [#allocation4], 0  ;;  %s4647_s0 = inlined_call_operand.hbm [shape: f32[2,16,16,32], index: 0, kind: input, shape index: {}]   ;;  %s4648_s1 = inlined_call_operand.vmem [shape: bf16[288,32], index: 1, kind: input, shape index: {}]   ;;  %s4649_s2 = inlined_call_operand.vmem [shape: f32[1,32], index: 2, kind: input, shape index: {}]   ;;  %s4650_s3 = inlined_call_operand.vmem [shape: f32[15,32], index: 3, kind: input, shape index: {}]   ;;  %s4651_s4 = inlined_call_operand.vmem [shape: f32[15,1], index: 4, kind: input, shape index: {}]   ;;  %s4652_s5 = inlined_call_operand.vmem [shape: f32[2,15,256], index: 5, kind: output, shape index: {}]  }
   0x1   :  { %12 = vsyncpa [#allocation4 + $0x1], 0  ;;  %s3115_s18 = smov 0   ;;  %s3117_s19 = smov 0  }
   0x2   :  { %s3119_s20 = smov 0   ;;  %s3121_s21 = smov 0  }
   0x3 LB: > { %s3134_s22 = sadd.s32 4294967295, %s3076_s21   ;;  %s3137_s23 = sadd.s32 1, %s3076_s21   ;;  %s3076_s21 = sphi %s3121_s21, %s4659_s21   ;;  %s3072_s20 = sphi %s3119_s20, %s4658_s20   ;;  %s3068_s19 = sphi %s3117_s19, %s4657_s19   ;;  %s3064_s18 = sphi %s3115_s18, %s4656_s18  }
   0x4   : > { %s22_s24 = ssub.s32 %s3076_s21, %s3137_s23  ;;  %s25_s25 = sadd.s32 1, %s3072_s20 }
   0x5   : > { %p23_p0 = scmp.eq.s32.totalorder %s22_s24, 0  ;;  %p32_p1 = scmp.ne.s32.totalorder %s3072_s20, %s3068_s19 }
   0x6   : > { %p33_p2 = scmp.eq.s32.totalorder %s3076_s21, 0  ;;  %p38_p3 = scmp.ne.s32.totalorder %s3068_s19, %s3064_s18 }
   0x7   : > { %s3147_s26 = scalar_select %p23_p0, %s3072_s20, %s25_s25  }
   0x8   : > { %p3149_p4 = por %p33_p2, %p32_p1  ;;  %p39_p5 = scmp.eq.s32.totalorder %s3134_s22, 0 }
   0x9   : > { %p2967_p6 = scmp.lt.s32.totalorder %s3076_s21, 2  ;;  %s184_s29 = sand.u32 1, %s3072_s20  }
   0xa   : > { %p3155_p7 = por %p39_p5, %p38_p3  ;;  %s2718_s30 = sshll.u32 %s184_s29, 8 }
   0xb   : > { %s2941_s6 = sshll.u32 %s3076_s21, 8  ;;  %s188_s10 = scalar_lea.vmem [#allocation3], %s2718_s30 }
   0xc   : > { %s193_s9 = scalar_lea.hbm %s4647_s0, %s2941_s6  ;;  %s196_s11 = sshll.u32 %s188_s10, 4  ;;  %s197_s11 = int_to_ptr.vmem [resolvable:$true] %s196_s11 }
   0xd   : > { %s194_s12 = sshll.u32 %s193_s9, 4  ;;  %p3166_p8 = pnand %p2967_p6, %p3149_p4  ;;  %s195_s12 = int_to_ptr.hbm [resolvable:$true] %s194_s12 }
   0xe   : > { %p2721_p9 = scmp.ge.s32.totalorder %s3076_s21, 1  ;;  %s185_s14 = scalar_lea.sflag [#allocation4], %s184_s29 }
   0xf   : > { %s3012_s15 = sshra.s32 %s195_s12, 4  ;;  %p3016_p11 = pneg %p3166_p8  ;;  %s3013_s15 = int_to_ptr.hbm [resolvable:$true] %s3012_s15 }
  0x10   : > { %s3014_s16 = scalar_lea.hbm %s3013_s15, 256  ;;  %s3019_s24 = scalar_lea.hbm %s4647_s0, 512 }
  0x11   : > { %p3015_p10 = scmp.ne.s32.totalorder %s3013_s15, %s3014_s16  ;;  %p3020_p0 = scmp.lt.s32.totalorder %s3013_s15, %s4647_s0 }
  0x12   : > { %p3021_p1 = scmp.lt.s32.totalorder %s3019_s24, %s3014_s16 }
  0x13   : > { %p3017_p12 = pnand %p3016_p11, %p3015_p10 }
  0x14   : > { %p3022_p2 = por %p3021_p1, %p3020_p0 }
  0x15   : > { %p3018_p13 = pneg %p3017_p12 }
  0x17   : > { %p3023_p3 = pnand %p3022_p2, %p3018_p13 }
  0x19   : > { %3026 = shalt.err (!%p3023_p3)
}
  0x1a   : > { %s3078_s29 = smov 128   ;;  %s3079_s30 = smov 8  }
  0x1b   : > { %2966 = dma.hbm_to_vmem [thread:$0]  (!%p3166_p8), %s195_s12, 4096, %s197_s11, %s185_s14, %s3078_s29, %s3078_s29, %s3079_s30  }
  0x1c   : > { %p204_p4 = scmp.lt.s32.totalorder %s3076_s21, 3 }
  0x1e   : > { %p205_p5 = pnand %p2721_p9, %p204_p4 }
  0x1f   : > { %s210_s6 = sand.u32 (!%p205_p5), 1, %s3068_s19  }
  0x20   : > { %208 = sbr.rel (%p205_p5) target bundleno = 1001 (0x3e9), region = 40  ;;  %s2722_s7 = sshll.u32 (!%p205_p5), %s210_s6, 8 }
  0x21   : > { %s211_s8 = scalar_lea.sflag (!%p205_p5), [#allocation4], %s210_s6  ;;  %s3185_s9 = scalar_lea.vmem (!%p205_p5), [#allocation3], %s2722_s7 }
  0x25   : > { %3059 = dma.done.wait (%p3155_p7), %s211_s8, 4096  }
  0x26   : > { %3061 = vsyncadd (%p3155_p7), %s211_s8, 4294963200  ;;  %v1182_v0 = vld [vmem:[%s3185_s9 + $0x1] sm:$0xff]  ;;  %s3080_s21 = smov 32   ;;  %v3201_v4 = vld [vmem:[%s3185_s9 + $0x10] sm:$0xff]  ;;  %s3081_s28 = smov 96   ;;  %vm405_vm0 = vcmask 1040384  }
  0x27   : > { %v3193_v1 = vld [vmem:[%s3185_s9] sm:$0xff]  ;;  %1246 = vrot.lane.b32.xlu1 %v1182_v0, %s3080_s21  ;;  %v877_v3 = vld [vmem:[%s3185_s9 + $0x8] sm:$0x7f]  ;;  %v3204_v5 = vrot.slane %v3201_v4, 7  ;;  %v2726_v6 = vld [vmem:[%s3185_s9 + $0x18] sm:$0x7f] }
  0x28   : > { %v3197_v2 = vrot.slane %v3193_v1, 7  ;;  %v941_v7 = vrot.slane %v877_v3, 7  ;;  %s3082_s10 = smov 64   ;;  %v1437_v8 = vrot.slane %v2726_v6, 7  ;;  %v1183_v9 = vld [vmem:[%s3185_s9 + $0x9] sm:$0x7f] }
  0x29   : > { %1481 = vrot.lane.b32.xlu2 %v3204_v5, %s3082_s10  ;;  %v3220_v12 = vld [vmem:[%s3185_s9 + $0x18] sm:$0xff]  ;;  %v3230_v14 = vld [vmem:[%s3185_s9 + $0x8] sm:$0xff]  ;;  %v3241_v18 = vld [vmem:[%s3185_s9 + $0x20] sm:$0xff]  ;;  %vm250_vm1 = vcmask 261120   ;;  %v3083_v44 = vmov 0.0   ;;  %vm663_vm2 = vcmask 523520  }
  0x2a   : > { %988 = vrot.lane.b32.xlu0 %v3197_v2, %s3081_s28  ;;  %v942_v10 = vsel %vm405_vm0, %v3197_v2, %v941_v7  ;;  %v1438_v11 = vsel %vm405_vm0, %v3204_v5, %v1437_v8  ;;  %v879_v13 = vld [vmem:[%s3185_s9 + $0x18] sm:$0x7f]  ;;  %v695_v15 = vld [vmem:[%s3185_s9 + $0x9] sm:$0x7f]  ;;  %v3252_v21 = vrot.slane %v3241_v18, 7  ;;  %v3281_v30 = vld [vmem:[%s3185_s9 + $0x30] sm:$0xff] }
  0x2b   : > { %v944_v16 = vrot.slane %v879_v13, 7  ;;  %v3246_v19 = vld [vmem:[%s3185_s9 + $0x11] sm:$0xff]  ;;  %v2728_v20 = vld [vmem:[%s3185_s9 + $0x28] sm:$0x7f]  ;;  %v1185_v23 = vld [vmem:[%s3185_s9 + $0x19] sm:$0x7f] }
  0x2c   : > { %v1440_v22 = vrot.slane %v2728_v20, 7  ;;  %v3262_v25 = vld [vmem:[%s3185_s9 + $0x28] sm:$0xff]  ;;  %v697_v27 = vld [vmem:[%s3185_s9 + $0x19] sm:$0x7f]  ;;  %v3295_v34 = vrot.slane %v3281_v30, 7  ;;  %v2949_v38 = vld [vmem:[%s4648_s1 + $0x30] sm:$0xff] }
  0x2d   : > { %v945_v17 = vsel %vm405_vm0, %v3204_v5, %v944_v16  ;;  %v881_v26 = vld [vmem:[%s3185_s9 + $0x28] sm:$0x7f]  ;;  %v2950_v32 = vld [vmem:[%s4648_s1 + $0x38] sm:$0xff]  ;;  %v2947_v42 = vld [vmem:[%s4648_s1 + $0x20] sm:$0xff]  ;;  %249 = vst [vmem:[#allocation2 + $0x8] sm:$0xff] %v3083_v44  ;;  %vm1084_vm3 = vcmask 1048321  }
  0x2e   : > { %v1441_v24 = vsel %vm405_vm0, %v3252_v21, %v1440_v22  ;;  %v947_v28 = vrot.slane %v881_v26, 7  ;;  %v3286_v31 = vld [vmem:[%s3185_s9 + $0x21] sm:$0xff]  ;;  %v2730_v33 = vld [vmem:[%s3185_s9 + $0x38] sm:$0x7f]  ;;  %2183 = vmatpush.bf16.msra.mxu0 %v2950_v32  ;;  %v1187_v36 = vld [vmem:[%s3185_s9 + $0x29] sm:$0x7f] }
  0x2f   : > { %1248 = vrot.lane.b32.xlu1 %v1183_v9, %s3080_s21  ;;  %v1443_v35 = vrot.slane %v2730_v33, 7  ;;  %v2958_v39 = vld [vmem:[%s4648_s1 + $0x78] sm:$0xff]  ;;  %v2948_v40 = vld [vmem:[%s4648_s1 + $0x28] sm:$0xff]  ;;  %v2957_v43 = vld [vmem:[%s4648_s1 + $0x70] sm:$0xff]  ;;  %1150 = vst.msk [vmem:[#allocation2 + $0x8] sm:$0xff] %vm250_vm1, %v3193_v1  ;;  %vm1571_vm4 = vcmask 785921  }
  0x30   : > { %v948_v29 = vsel %vm405_vm0, %v3252_v21, %v947_v28  ;;  %2272 = vmatpush.bf16.msra.mxu1 %v2958_v39  ;;  %v3314_v41 = vld [vmem:[%s3185_s9 + $0x38] sm:$0xff]  ;;  %248 = vst [vmem:[#allocation2] sm:$0xff] %v3083_v44  ;;  %v3356_v48 = vld [vmem:[%s3185_s9 + $0x40] sm:$0xff]  ;;  %v3384_v51 = vld [vmem:[%s3185_s9 + $0x48] sm:$0xff]  ;;  %vm1343_vm5 = vcmask 522496   ;;  %vm1086_vm6 = vcmask 1048320  }
  0x31   : > { %1483 = vrot.lane.b32.xlu2 %v1438_v11, %s3082_s10  ;;  %v1444_v37 = vsel %vm405_vm0, %v3295_v34, %v1443_v35  ;;  %v883_v45 = vld [vmem:[%s3185_s9 + $0x38] sm:$0x7f]  ;;  %251 = vst.msk [vmem:[#allocation2 + $0x10] sm:$0xff] %vm250_vm1, %v3083_v44  ;;  %v3365_v49 = vrot.slane %v3356_v48, 7  ;;  %v2956_v55 = vld [vmem:[%s4648_s1 + $0x68] sm:$0xff]  ;;  %v2945_v60 = vld [vmem:[%s4648_s1 + $0x10] sm:$0xff] }
  0x32   : > { %990 = vrot.lane.b32.xlu0 %v942_v10, %s3081_s28  ;;  %2184 = vmatpush.bf16.msra.mxu0 %v2949_v38  ;;  %252 = vst [vmem:[#allocation2 + $0x18] sm:$0xff] %v3083_v44  ;;  %v950_v46 = vrot.slane %v883_v45, 7  ;;  %v1189_v50 = vld [vmem:[%s3185_s9 + $0x39] sm:$0x7f]  ;;  %v699_v56 = vld [vmem:[%s3185_s9 + $0x29] sm:$0x7f] }
  0x33   : > { %253 = vst [vmem:[#allocation2 + $0x20] sm:$0xff] %v3083_v44  ;;  %v2946_v54 = vld [vmem:[%s4648_s1 + $0x18] sm:$0xff]  ;;  %v2955_v61 = vld [vmem:[%s4648_s1 + $0x60] sm:$0xff]  ;;  %v885_v63 = vld [vmem:[%s3185_s9 + $0x48] sm:$0x7f]  ;;  %vm844_vm7 = vcmask 785920  }
  0x34   : > { %2273 = vmatpush.bf16.msra.mxu1 %v2957_v43  ;;  %254 = vst.msk [vmem:[#allocation2 + $0x28] sm:$0xff] %vm250_vm1, %v3083_v44  ;;  %v951_v47 = vsel %vm405_vm0, %v3295_v34, %v950_v46  ;;  %v3463_v58 = vld [vmem:[%s3185_s9 + $0x31] sm:$0xff]  ;;  %v2944_v3 = vld [vmem:[%s4648_s1 + $0x8] sm:$0xff]  ;;  %v2943_v9 = vld [vmem:[%s4648_s1] sm:$0xff]  ;;  %vm482_vm8 = vcmask 261121   ;;  %vm1813_vm9 = vcmask 260096  }
  0x35   : > { %255 = vst [vmem:[#allocation2 + $0x30] sm:$0xff] %v3083_v44  ;;  %v2954_v6 = vld [vmem:[%s4648_s1 + $0x58] sm:$0xff]  ;;  %v2953_v10 = vld [vmem:[%s4648_s1 + $0x50] sm:$0xff]  ;;  %v2959_v16 = vld [vmem:[%s4648_s1 + $0x80] sm:$0xff]  ;;  %vm846_vm10 = vcmask 784896   ;;  %p242_p6 = scmp.lt.s32.totalorder %s3134_s22, 1 }
  0x36   : > { %2185 = vmatpush.bf16.msra.mxu0 %v2948_v40  ;;  %256 = vst [vmem:[#allocation2 + $0x38] sm:$0xff] %v3083_v44  ;;  %v3530_v22 = vld [vmem:[%s3185_s9 + $0x50] sm:$0xff]  ;;  %v2951_v28 = vld [vmem:[%s4648_s1 + $0x40] sm:$0xff]  ;;  %v3564_v33 = vld [vmem:[%s3185_s9 + $0x58] sm:$0xff] }
  0x37   : > { %1664 = vrot.lane.b32.xlu1 %v3220_v12, %s3081_s28  ;;  %257 = vst.msk [vmem:[#allocation2 + $0x40] sm:$0xff] %vm250_vm1, %v3083_v44  ;;  %v701_v38 = vld [vmem:[%s3185_s9 + $0x39] sm:$0x7f]  ;;  %v3590_v39 = vld [vmem:[%s3185_s9 + $0x41] sm:$0xff]  ;;  %s4661_s22 = smov (!%p242_p6, %s3134_s22), 1 }
  0x38   : > { %258 = vst [vmem:[#allocation2 + $0x48] sm:$0xff] %v3083_v44  ;;  %2274 = vmatpush.bf16.msra.mxu1 %v2956_v55  ;;  %v346_v43 = vld [vmem:[%s3185_s9 + $0x8] sm:$0x7f]  ;;  %s2942_s30 = sshll.u32 %s4661_s22, 5 }
  0x39   : > { %573 = vrot.lane.b32.xlu2 %v3193_v1, %s3080_s21  ;;  %259 = vst [vmem:[#allocation2 + $0x50] sm:$0xff] %v3083_v44  ;;  %v2960_v1 = vld [vmem:[%s4648_s1 + $0x88] sm:$0xff]  ;;  %v407_v46 = vrot.slane %v346_v43, 7  ;;  %s246_s8 = scalar_lea.vmem %s4652_s5, %s2942_s30 }
  0x3a   : > { %1662 = vrot.lane.b32.xlu0 %v3201_v4, %s3081_s28  ;;  %2186 = vmatpush.bf16.msra.mxu0 %v2947_v42  ;;  %260 = vst.msk [vmem:[#allocation2 + $0x58] sm:$0xff] %vm250_vm1, %v3083_v44  ;;  %v887_v42 = vld [vmem:[%s3185_s9 + $0x58] sm:$0x7f] }
  0x3b   : > { %261 = vst [vmem:[#allocation2 + $0x60] sm:$0xff] %v3083_v44  ;;  %2367 = vmatpush.bf16.msra.mxu2 %v2960_v1 }
  0x3c   : > { %262 = vst [vmem:[#allocation2 + $0x68] sm:$0xff] %v3083_v44  ;;  %2275 = vmatpush.bf16.msra.mxu1 %v2955_v61  ;;  %v1193_v61 = vld [vmem:[%s3185_s9 + $0x59] sm:$0x7f] }
  0x3d   : > { %263 = vst.msk [vmem:[#allocation2 + $0x70] sm:$0xff] %vm250_vm1, %v3083_v44 }
  0x3e   : > { %264 = vst [vmem:[#allocation2 + $0x78] sm:$0xff] %v3083_v44  ;;  %2187 = vmatpush.bf16.msra.mxu0 %v2946_v54 }
  0x3f   : > { %754 = vrot.lane.b32.xlu1 %v1182_v0, %s3082_s10  ;;  %265 = vst [vmem:[#allocation2 + $0x80] sm:$0xff] %v3083_v44  ;;  %v953_v0 = vrot.slane %v885_v63, 7  ;;  %2368 = vmatpush.bf16.msra.mxu2 %v2959_v16  ;;  %v3666_v16 = vld [vmem:[%s3185_s9 + $0x68] sm:$0xff] }
  0x40   : > { %266 = vst.msk [vmem:[#allocation2 + $0x88] sm:$0xff] %vm250_vm1, %v3083_v44  ;;  %2276 = vmatpush.bf16.msra.mxu1 %v2954_v6 }
  0x41   : > { %756 = vrot.lane.b32.xlu2 %v695_v15, %s3082_s10  ;;  %267 = vst [vmem:[#allocation2 + $0x90] sm:$0xff] %v3083_v44  ;;  %v954_v7 = vsel %vm405_vm0, %v3365_v49, %v953_v0  ;;  %v2952_v15 = vld [vmem:[%s4648_s1 + $0x48] sm:$0xff] }
  0x42   : > { %575 = vrot.lane.b32.xlu0 %v3230_v14, %s3080_s21  ;;  %268 = vst [vmem:[#allocation2 + $0x98] sm:$0xff] %v3083_v44  ;;  %2188 = vmatpush.bf16.msra.mxu0 %v2945_v60 }
  0x43   : > { %269 = vst.msk [vmem:[#allocation2 + $0xa0] sm:$0xff] %vm250_vm1, %v3083_v44 }
  0x44   : > { %270 = vst [vmem:[#allocation2 + $0xa8] sm:$0xff] %v3083_v44  ;;  %2277 = vmatpush.bf16.msra.mxu1 %v2953_v10 }
  0x45   : > { %271 = vst [vmem:[#allocation2 + $0xb0] sm:$0xff] %v3083_v44 }
  0x46   : > { %272 = vst.msk [vmem:[#allocation2 + $0xb8] sm:$0xff] %vm250_vm1, %v3083_v44  ;;  %2189 = vmatpush.bf16.msra.mxu0 %v2944_v3 }
  0x47   : > { %994 = vrot.lane.b32.xlu1 %v945_v17, %s3081_s28  ;;  %273 = vst [vmem:[#allocation2 + $0xc0] sm:$0xff] %v3083_v44  ;;  %v2732_v17 = vld [vmem:[%s3185_s9 + $0x48] sm:$0x7f] }
  0x48   : > { %274 = vst [vmem:[#allocation2 + $0xc8] sm:$0xff] %v3083_v44  ;;  %v1446_v20 = vrot.slane %v2732_v17, 7  ;;  %2278 = vmatpush.bf16.msra.mxu1 %v2952_v15 }
  0x49   : > { %1250 = vrot.lane.b32.xlu2 %v3246_v19, %s3080_s21  ;;  %275 = vst.msk [vmem:[#allocation2 + $0xd0] sm:$0xff] %vm250_vm1, %v3083_v44 }
  0x4a   : > { %992 = vrot.lane.b32.xlu0 %v3204_v5, %s3081_s28  ;;  %276 = vst [vmem:[#allocation2 + $0xd8] sm:$0xff] %v3083_v44  ;;  %2190 = vmatpush.bf16.msra.mxu0 %v2943_v9 }
  0x4b   : > { %277 = vst [vmem:[#allocation2 + $0xe0] sm:$0xff] %v3083_v44 }
  0x4c   : > { %278 = vst.msk [vmem:[#allocation2 + $0xe8] sm:$0xff] %vm250_vm1, %v3083_v44  ;;  %2279 = vmatpush.bf16.msra.mxu1 %v2951_v28  ;;  %v703_v28 = vld [vmem:[%s3185_s9 + $0x49] sm:$0x7f] }
  0x4d   : > { %279 = vst [vmem:[#allocation2 + $0xf0] sm:$0xff] %v3083_v44 }
  0x4e   : > { %280 = vst [vmem:[#allocation2 + $0xf8] sm:$0xff] %v3083_v44 }
  0x4f   : > { %1485 = vrot.lane.b32.xlu1 %v3252_v21, %s3082_s10  ;;  %281 = vst.msk [vmem:[#allocation2 + $0x100] sm:$0xff] %vm250_vm1, %v3083_v44 }
  0x50   : > { %282 = vst [vmem:[#allocation2 + $0x108] sm:$0xff] %v3083_v44 }
  0x51   : > { %1487 = vrot.lane.b32.xlu2 %v1441_v24, %s3082_s10  ;;  %283 = vst [vmem:[#allocation2 + $0x110] sm:$0xff] %v3083_v44  ;;  %v3536_v24 = vrot.slane %v3530_v22, 7 }
  0x52   : > { %1252 = vrot.lane.b32.xlu0 %v1185_v23, %s3080_s21  ;;  %284 = vst.msk [vmem:[#allocation2 + $0x118] sm:$0xff] %vm250_vm1, %v3083_v44  ;;  %v1191_v23 = vld [vmem:[%s3185_s9 + $0x49] sm:$0x7f] }
  0x53   : > { %285 = vst [vmem:[#allocation2 + $0x120] sm:$0xff] %v3083_v44 }
  0x54   : > { %286 = vst [vmem:[#allocation2 + $0x128] sm:$0xff] %v3083_v44 }
  0x55   : > { %287 = vst.msk [vmem:[#allocation2 + $0x130] sm:$0xff] %vm250_vm1, %v3083_v44 }
  0x56   : > { %288 = vst [vmem:[#allocation2 + $0x138] sm:$0xff] %v3083_v44 }
  0x57   : > { %1668 = vrot.lane.b32.xlu1 %v3262_v25, %s3081_s28  ;;  %289 = vst [vmem:[#allocation2 + $0x140] sm:$0xff] %v3083_v44 }
  0x58   : > { %290 = vst.msk [vmem:[#allocation2 + $0x148] sm:$0xff] %vm250_vm1, %v3083_v44 }
  0x59   : > { %577 = vrot.lane.b32.xlu2 %v3201_v4, %s3080_s21  ;;  %291 = vst [vmem:[#allocation2 + $0x150] sm:$0xff] %v3083_v44 }
  0x5a   : > { %1666 = vrot.lane.b32.xlu0 %v3241_v18, %s3081_s28  ;;  %292 = vst [vmem:[#allocation2 + $0x158] sm:$0xff] %v3083_v44 }
  0x5b   : > { %293 = vst.msk [vmem:[#allocation2 + $0x160] sm:$0xff] %vm250_vm1, %v3083_v44 }
  0x5c   : > { %294 = vst [vmem:[#allocation2 + $0x168] sm:$0xff] %v3083_v44 }
  0x5d   : > { %295 = vst [vmem:[#allocation2 + $0x170] sm:$0xff] %v3083_v44 }
  0x5e   : > { %296 = vst.msk [vmem:[#allocation2 + $0x178] sm:$0xff] %vm250_vm1, %v3083_v44 }
  0x5f   : > { %758 = vrot.lane.b32.xlu1 %v3246_v19, %s3082_s10  ;;  %297 = vst [vmem:[#allocation2 + $0x180] sm:$0xff] %v3083_v44 }
  0x60   : > { %298 = vst [vmem:[#allocation2 + $0x188] sm:$0xff] %v3083_v44 }
  0x61   : > { %760 = vrot.lane.b32.xlu2 %v697_v27, %s3082_s10  ;;  %299 = vst.msk [vmem:[#allocation2 + $0x190] sm:$0xff] %vm250_vm1, %v3083_v44  ;;  %v1447_v27 = vsel %vm405_vm0, %v3365_v49, %v1446_v20  ;;  %v2788_v20 = vld [vmem:[%s3185_s9 + $0x29] sm:$0x7f] }
  0x62   : > { %579 = vrot.lane.b32.xlu0 %v3220_v12, %s3080_s21  ;;  %300 = vst [vmem:[#allocation2 + $0x198] sm:$0xff] %v3083_v44 }
  0x63   : > { %301 = vst [vmem:[#allocation2 + $0x1a0] sm:$0xff] %v3083_v44 }
  0x64   : > { %302 = vst.msk [vmem:[#allocation2 + $0x1a8] sm:$0xff] %vm250_vm1, %v3083_v44 }
  0x65   : > { %303 = vst [vmem:[#allocation2 + $0x1b0] sm:$0xff] %v3083_v44 }
  0x66   : > { %304 = vst [vmem:[#allocation2 + $0x1b8] sm:$0xff] %v3083_v44 }
  0x67   : > { %998 = vrot.lane.b32.xlu1 %v948_v29, %s3081_s28  ;;  %305 = vst.msk [vmem:[#allocation2 + $0x1c0] sm:$0xff] %vm250_vm1, %v3083_v44 }
  0x68   : > { %306 = vst [vmem:[#allocation2 + $0x1c8] sm:$0xff] %v3083_v44 }
  0x69   : > { %1254 = vrot.lane.b32.xlu2 %v3286_v31, %s3080_s21  ;;  %307 = vst [vmem:[#allocation2 + $0x1d0] sm:$0xff] %v3083_v44 }
  0x6a   : > { %996 = vrot.lane.b32.xlu0 %v3252_v21, %s3081_s28  ;;  %308 = vst.msk [vmem:[#allocation2 + $0x1d8] sm:$0xff] %vm250_vm1, %v3083_v44 }
  0x6b   : > { %309 = vst [vmem:[#allocation2 + $0x1e0] sm:$0xff] %v3083_v44 }
  0x6c   : > { %310 = vst [vmem:[#allocation2 + $0x1e8] sm:$0xff] %v3083_v44 }
  0x6d   : > { %311 = vst.msk [vmem:[#allocation2 + $0x1f0] sm:$0xff] %vm250_vm1, %v3083_v44 }
  0x6e   : > { %312 = vst [vmem:[#allocation2 + $0x1f8] sm:$0xff] %v3083_v44 }
  0x6f   : > { %1489 = vrot.lane.b32.xlu1 %v3295_v34, %s3082_s10  ;;  %313 = vst [vmem:[#allocation2 + $0x200] sm:$0xff] %v3083_v44 }
  0x70   : > { %314 = vst.msk [vmem:[#allocation2 + $0x208] sm:$0xff] %vm250_vm1, %v3083_v44 }
  0x71   : > { %1491 = vrot.lane.b32.xlu2 %v1444_v37, %s3082_s10  ;;  %315 = vst [vmem:[#allocation2 + $0x210] sm:$0xff] %v3083_v44 }
  0x72   : > { %1256 = vrot.lane.b32.xlu0 %v1187_v36, %s3080_s21  ;;  %316 = vst [vmem:[#allocation2 + $0x218] sm:$0xff] %v3083_v44 }
  0x73   : > { %317 = vst.msk [vmem:[#allocation2 + $0x220] sm:$0xff] %vm250_vm1, %v3083_v44 }
  0x74   : > { %318 = vst [vmem:[#allocation2 + $0x228] sm:$0xff] %v3083_v44 }
  0x75   : > { %319 = vst [vmem:[#allocation2 + $0x230] sm:$0xff] %v3083_v44 }
  0x76   : > { %320 = vst.msk [vmem:[#allocation2 + $0x238] sm:$0xff] %vm250_vm1, %v3083_v44 }
  0x77   : > { %1672 = vrot.lane.b32.xlu1 %v3314_v41, %s3081_s28  ;;  %321 = vst [vmem:[#allocation2 + $0x240] sm:$0xff] %v3083_v44 }
  0x78   : > { %322 = vst [vmem:[#allocation2 + $0x248] sm:$0xff] %v3083_v44 }
  0x79   : > { %581 = vrot.lane.b32.xlu2 %v3241_v18, %s3080_s21  ;;  %323 = vst.msk [vmem:[#allocation2 + $0x250] sm:$0xff] %vm250_vm1, %v3083_v44 }
  0x7a   : > { %1670 = vrot.lane.b32.xlu0 %v3281_v30, %s3081_s28  ;;  %324 = vst [vmem:[#allocation2 + $0x258] sm:$0xff] %v3083_v44 }
  0x7b   : > { %325 = vst [vmem:[#allocation2 + $0x260] sm:$0xff] %v3083_v44 }
  0x7c   : > { %326 = vst.msk [vmem:[#allocation2 + $0x268] sm:$0xff] %vm250_vm1, %v3083_v44 }
  0x7d   : > { %327 = vst [vmem:[#allocation2 + $0x270] sm:$0xff] %v3083_v44 }
  0x7e   : > { %328 = vst [vmem:[#allocation2 + $0x278] sm:$0xff] %v3083_v44 }
  0x7f   : > { %762 = vrot.lane.b32.xlu1 %v3286_v31, %s3082_s10  ;;  %329 = vst.msk [vmem:[#allocation2 + $0x280] sm:$0xff] %vm250_vm1, %v3083_v44 }
  0x80   : > { %330 = vst [vmem:[#allocation2 + $0x288] sm:$0xff] %v3083_v44 }
  0x81   : > { %764 = vrot.lane.b32.xlu2 %v699_v56, %s3082_s10  ;;  %331 = vst [vmem:[#allocation2 + $0x290] sm:$0xff] %v3083_v44 }
  0x82   : > { %583 = vrot.lane.b32.xlu0 %v3262_v25, %s3080_s21  ;;  %332 = vst.msk [vmem:[#allocation2 + $0x298] sm:$0xff] %vm250_vm1, %v3083_v44 }
  0x83   : > { %v3457_v57 = vpop.permute.xlu2 %1481  ;;  %333 = vst [vmem:[#allocation2 + $0x2a0] sm:$0xff] %v3083_v44 }
  0x84   : > { %334 = vst [vmem:[#allocation2 + $0x2a8] sm:$0xff] %v3083_v44 }
  0x85   : > { %335 = vst.msk [vmem:[#allocation2 + $0x2b0] sm:$0xff] %vm250_vm1, %v3083_v44 }
  0x86   : > { %336 = vst [vmem:[#allocation2 + $0x2b8] sm:$0xff] %v3083_v44 }
  0x87   : > { %1002 = vrot.lane.b32.xlu1 %v951_v47, %s3081_s28  ;;  %337 = vst [vmem:[#allocation2 + $0x2c0] sm:$0xff] %v3083_v44  ;;  %v2786_v47 = vld [vmem:[%s3185_s9 + $0x19] sm:$0x7f] }
  0x88   : > { %338 = vst.msk [vmem:[#allocation2 + $0x2c8] sm:$0xff] %vm250_vm1, %v3083_v44 }
  0x89   : > { %1258 = vrot.lane.b32.xlu2 %v3463_v58, %s3080_s21  ;;  %339 = vst [vmem:[#allocation2 + $0x2d0] sm:$0xff] %v3083_v44 }
  0x8a   : > { %1000 = vrot.lane.b32.xlu0 %v3295_v34, %s3081_s28  ;;  %340 = vst [vmem:[#allocation2 + $0x2d8] sm:$0xff] %v3083_v44 }
  0x8b   : > { %v3498_v8 = vpop.permute.xlu2 %1483  ;;  %341 = vst.msk [vmem:[#allocation2 + $0x2e0] sm:$0xff] %vm250_vm1, %v3083_v44 }
  0x8c   : > { %342 = vst [vmem:[#allocation2 + $0x2e8] sm:$0xff] %v3083_v44 }
  0x8d   : > { %343 = vst [vmem:[#allocation2 + $0x2f0] sm:$0xff] %v3083_v44 }
  0x8e   : > { %344 = vst.msk [vmem:[#allocation2 + $0x2f8] sm:$0xff] %vm250_vm1, %v3083_v44  ;;  %v956_v44 = vrot.slane %v887_v42, 7 }
  0x8f   : > { %1493 = vrot.lane.b32.xlu1 %v3365_v49, %s3082_s10  ;;  %1151 = vst.msk [vmem:[#allocation2 + $0x20] sm:$0xff] %vm250_vm1, %v3230_v14 }
  0x90   : > { %483 = vst.msk [vmem:[#allocation2 + $0x30] sm:$0xfe] %vm482_vm8, %v3197_v2 }
  0x91   : > { %1495 = vrot.lane.b32.xlu2 %v1447_v27, %s3082_s10  ;;  %1812 = vst.msk [vmem:[#allocation2 + $0x10] sm:$0xff] %vm250_vm1, %v3246_v19  ;;  %v3634_v19 = vld [vmem:[%s3185_s9 + $0x60] sm:$0xff] }
  0x92   : > { %1260 = vrot.lane.b32.xlu0 %v1189_v50, %s3080_s21  ;;  %1814 = vst.msk [vmem:[#allocation2 + $0x28] sm:$0x7f] %vm1813_vm9, %v2786_v47  ;;  %v3645_v1 = vrot.slane %v3634_v19, 7 }
  0x93   : > { %v3539_v26 = vpop.permute.xlu2 %573  ;;  %1152 = vst.msk [vmem:[#allocation2 + $0x38] sm:$0xff] %vm250_vm1, %v3201_v4  ;;  %v348_v4 = vld [vmem:[%s3185_s9 + $0x18] sm:$0x7f] }
  0x94   : > { %664 = vst.msk [vmem:[#allocation2 + $0x30] sm:$0xff] %vm663_vm2, %v3539_v26  ;;  %v410_v15 = vrot.slane %v348_v4, 7  ;;  %v706_v4 = vld [vmem:[%s3185_s9 + $0x61] sm:$0xff] }
  0x95   : > { %1153 = vst.msk [vmem:[#allocation2 + $0x50] sm:$0xff] %vm250_vm1, %v3220_v12 }
  0x96   : > { %485 = vst.msk [vmem:[#allocation2 + $0x60] sm:$0xfe] %vm482_vm8, %v3204_v5 }
  0x97   : > { %1676 = vrot.lane.b32.xlu1 %v3384_v51, %s3081_s28  ;;  %1815 = vst.msk [vmem:[#allocation2 + $0x40] sm:$0xff] %vm250_vm1, %v3286_v31  ;;  %v3689_v31 = vld [vmem:[%s3185_s9 + $0x51] sm:$0xff] }
  0x98   : > { %v1845_v6 = vld [vmem:[#allocation2 + $0x10] sm:$0xff]  ;;  %1816 = vst.msk [vmem:[#allocation2 + $0x58] sm:$0x7f] %vm1813_vm9, %v2788_v20 }
  0x99   : > { %v1247_v52 = vpop.permute.xlu1 %1246  ;;  %585 = vrot.lane.b32.xlu2 %v3281_v30, %s3080_s21  ;;  %1154 = vst.msk [vmem:[#allocation2 + $0x68] sm:$0xff] %vm250_vm1, %v3241_v18 }
  0x9a   : > { %1674 = vrot.lane.b32.xlu0 %v3356_v48, %s3081_s28  ;;  %1342 = vst.msk [vmem:[#allocation2 + $0x8] sm:$0xff] %vm663_vm2, %v1247_v52  ;;  %v2734_v52 = vld [vmem:[%s3185_s9 + $0x58] sm:$0x7f] }
  0x9b   : > { %v3568_v35 = vpop.permute.xlu2 %756  ;;  %1572 = vst.msk [vmem:[#allocation2 + $0x8] sm:$0xfe] %vm1571_vm4, %v3457_v57  ;;  %v1449_v56 = vrot.slane %v2734_v52, 7 }
  0x9c   : > { %v3439_v53 = vpop.permute.xlu0 %988  ;;  %1155 = vst.msk [vmem:[#allocation2 + $0x80] sm:$0xff] %vm250_vm1, %v3262_v25 }
  0x9d   : > { %1085 = vst.msk [vmem:[#allocation2] sm:$0xfe] %vm1084_vm3, %v3439_v53  ;;  %v408_v53 = vsel %vm405_vm0, %v3197_v2, %v407_v46  ;;  %v1450_v0 = vsel %vm405_vm0, %v3536_v24, %v1449_v56  ;;  %v2736_v46 = vld [vmem:[%s3185_s9 + $0x68] sm:$0x7f] }
  0x9e   : > { %484 = vst.msk [vmem:[#allocation2 + $0x48] sm:$0xff] %vm250_vm1, %v408_v53  ;;  %v1452_v53 = vrot.slane %v2736_v46, 7 }
  0x9f   : > { %766 = vrot.lane.b32.xlu1 %v3463_v58, %s3082_s10  ;;  %487 = vst.msk [vmem:[#allocation2 + $0x90] sm:$0xfe] %vm482_vm8, %v3252_v21 }
  0xa0   : > { %1817 = vst.msk [vmem:[#allocation2 + $0x70] sm:$0xff] %vm250_vm1, %v3463_v58 }
  0xa1   : > { %v3465_v59 = vpop.permute.xlu1 %1248  ;;  %768 = vrot.lane.b32.xlu2 %v701_v38, %s3082_s10  ;;  %v1854_v38 = vld [vmem:[#allocation2 + $0x58] sm:$0xff]  ;;  %1156 = vst.msk [vmem:[#allocation2 + $0x98] sm:$0xff] %vm250_vm1, %v3281_v30 }
  0xa2   : > { %587 = vrot.lane.b32.xlu0 %v3314_v41, %s3080_s21  ;;  %1344 = vst.msk [vmem:[#allocation2 + $0x20] sm:$0x7f] %vm1343_vm5, %v3465_v59 }
  0xa3   : > { %v1251_v40 = vpop.permute.xlu2 %1250  ;;  %1573 = vst.msk [vmem:[#allocation2 + $0x20] sm:$0xff] %vm844_vm7, %v3498_v8 }
  0xa4   : > { %v3477_v62 = vpop.permute.xlu0 %990  ;;  %v1843_v54 = vld [vmem:[#allocation2] sm:$0xff]  ;;  %1345 = vst.msk [vmem:[#allocation2 + $0x38] sm:$0xff] %vm663_vm2, %v1251_v40 }
  0xa5   : > { %1087 = vst.msk [vmem:[#allocation2 + $0x18] sm:$0xff] %vm1086_vm6, %v3477_v62 }
  0xa6   : > { %1157 = vst.msk [vmem:[#allocation2 + $0xb0] sm:$0xff] %vm250_vm1, %v3314_v41 }
  0xa7   : > { %1006 = vrot.lane.b32.xlu1 %v954_v7, %s3081_s28  ;;  %v1848_v7 = vld [vmem:[#allocation2 + $0x28] sm:$0xff]  ;;  %489 = vst.msk [vmem:[#allocation2 + $0xc0] sm:$0xfe] %vm482_vm8, %v3295_v34 }
  0xa8   : > { %v1941_v8 = vpack.c.bf16 %v1848_v7, %v1845_v6  ;;  %1819 = vst.msk [vmem:[#allocation2 + $0xa0] sm:$0xff] %vm250_vm1, %v3590_v39 }
  0xa9   : > { %v3513_v11 = vpop.permute.xlu1 %1664  ;;  %1262 = vrot.lane.b32.xlu2 %v3590_v39, %s3080_s21  ;;  %1159 = vst.msk [vmem:[#allocation2 + $0xe0] sm:$0xff] %vm250_vm1, %v3384_v51 }
  0xaa   : > { %1004 = vrot.lane.b32.xlu0 %v3365_v49, %s3081_s28  ;;  %1753 = vst.msk [vmem:[#allocation2 + $0x20] sm:$0xff] %vm1086_vm6, %v3513_v11  ;;  %v957_v49 = vsel %vm405_vm0, %v3536_v24, %v956_v44  ;;  %2887 = vmatmul.msk.bf16.vlgmr.msra.gmra.mxu2 %vm250_vm1, %v1941_v8  ;;  %v3759_v8 = vld [vmem:[%s3185_s9 + $0x78] sm:$0xff] }
  0xab   : > { %v1488_v50 = vpop.permute.xlu2 %1487  ;;  %1821 = vst.msk [vmem:[#allocation2 + $0xd0] sm:$0xff] %vm250_vm1, %v3689_v31 }
  0xac   : > { %v3515_v13 = vpop.permute.xlu0 %1662  ;;  %v1846_v55 = vld [vmem:[#allocation2 + $0x18] sm:$0xff]  ;;  %1160 = vst.msk [vmem:[#allocation2 + $0xf8] sm:$0xff] %vm250_vm1, %v3530_v22 }
  0xad   : > { %1752 = vst.msk [vmem:[#allocation2 + $0x8] sm:$0xff] %vm1086_vm6, %v3515_v13  ;;  %v1939_v57 = vpack.c.bf16 %v1846_v55, %v1843_v54  ;;  %v3726_v54 = vld [vmem:[%s3185_s9 + $0x70] sm:$0xff] }
  0xae   : > { %1161 = vst.msk [vmem:[#allocation2 + $0x110] sm:$0xff] %vm250_vm1, %v3564_v33 }
  0xaf   : > { %1497 = vrot.lane.b32.xlu1 %v3536_v24, %s3082_s10  ;;  %2191 = vmatmul.bf16.vlgmr.msra.gmra.mxu0 %v1939_v57  ;;  %v1195_v57 = vld [vmem:[%s3185_s9 + $0x69] sm:$0x7f]  ;;  %493 = vst.msk [vmem:[#allocation2 + $0x120] sm:$0xfe] %vm482_vm8, %v3536_v24 }
  0xb0   : > { %1823 = vst.msk [vmem:[#allocation2 + $0x100] sm:$0xff] %vm250_vm1, %v706_v4 }
  0xb1   : > { %v3555_v29 = vpop.permute.xlu1 %754  ;;  %v1847_v2 = vld [vmem:[#allocation2 + $0x20] sm:$0xff]  ;;  %1499 = vrot.lane.b32.xlu2 %v1450_v0, %s3082_s10  ;;  %v2792_v0 = vld [vmem:[%s3185_s9 + $0x49] sm:$0x7f]  ;;  %1162 = vst.msk [vmem:[#allocation2 + $0x128] sm:$0xff] %vm250_vm1, %v3634_v19 }
  0xb2   : > { %1264 = vrot.lane.b32.xlu0 %v1191_v23, %s3080_s21  ;;  %845 = vst.msk [vmem:[#allocation2 + $0x30] sm:$0xff] %vm844_vm7, %v3555_v29  ;;  %v411_v23 = vsel %vm405_vm0, %v3204_v5, %v410_v15 }
  0xb3   : > { %v578_v3 = vpop.permute.xlu2 %577  ;;  %486 = vst.msk [vmem:[#allocation2 + $0x78] sm:$0xff] %vm250_vm1, %v411_v23 }
  0xb4   : > { %v3557_v32 = vpop.permute.xlu0 %575  ;;  %v1844_v62 = vld [vmem:[#allocation2 + $0x8] sm:$0xff]  ;;  %666 = vst.msk [vmem:[#allocation2 + $0x60] sm:$0xff] %vm663_vm2, %v578_v3  ;;  %v352_v3 = vld [vmem:[%s3185_s9 + $0x38] sm:$0x7f] }
  0xb5   : > { %665 = vst.msk [vmem:[#allocation2 + $0x48] sm:$0xff] %vm663_vm2, %v3557_v32  ;;  %v1940_v63 = vpack.c.bf16 %v1847_v2, %v1844_v62  ;;  %v3736_v2 = vrot.slane %v3726_v54, 7  ;;  %v416_v7 = vrot.slane %v352_v3, 7  ;;  %v1199_v3 = vld [vmem:[%s3185_s9 + $0x89] sm:$0x7f] }
  0xb6   : > { %847 = vst.msk [vmem:[#allocation2 + $0x48] sm:$0x7f] %vm846_vm10, %v3568_v35  ;;  %v889_v35 = vld [vmem:[%s3185_s9 + $0x68] sm:$0x7f] }
  0xb7   : > { %1680 = vrot.lane.b32.xlu1 %v3564_v33, %s3081_s28  ;;  %2280 = vmatmul.bf16.vlgmr.msra.gmra.mxu1 %v1940_v63  ;;  %v959_v40 = vrot.slane %v889_v35, 7  ;;  %1820 = vst.msk [vmem:[#allocation2 + $0xb8] sm:$0x7f] %vm1813_vm9, %v2792_v0 }
  0xb8   : > { %1163 = vst.msk [vmem:[#allocation2 + $0x140] sm:$0xff] %vm250_vm1, %v3666_v16 }
  0xb9   : > { %v995_v36 = vpop.permute.xlu1 %994  ;;  %589 = vrot.lane.b32.xlu2 %v3356_v48, %s3080_s21  ;;  %v960_v18 = vsel %vm405_vm0, %v3645_v1, %v959_v40  ;;  %495 = vst.msk [vmem:[#allocation2 + $0x150] sm:$0xfe] %vm482_vm8, %v3645_v1 }
  0xba   : > { %1678 = vrot.lane.b32.xlu0 %v3530_v22, %s3081_s28  ;;  %1089 = vst.msk [vmem:[#allocation2 + $0x48] sm:$0xff] %vm1086_vm6, %v995_v36  ;;  %v1851_v36 = vld [vmem:[#allocation2 + $0x40] sm:$0xff] }
  0xbb   : > { %v761_v17 = vpop.permute.xlu2 %760  ;;  %v1944_v42 = vpack.c.bf16 %v1854_v38, %v1851_v36  ;;  %1164 = vst.msk [vmem:[#allocation2 + $0x158] sm:$0xff] %vm250_vm1, %v3726_v54 }
  0xbc   : > { %v3581_v37 = vpop.permute.xlu0 %992  ;;  %1165 = vst.msk [vmem:[#allocation2 + $0x170] sm:$0xff] %vm250_vm1, %v3759_v8 }
  0xbd   : > { %1088 = vst.msk [vmem:[#allocation2 + $0x30] sm:$0xfe] %vm1084_vm3, %v3581_v37  ;;  %v350_v37 = vld [vmem:[%s3185_s9 + $0x28] sm:$0x7f]  ;;  %2888 = vmatmul.msk.bf16.gmra.mxu2 %vm250_vm1, %v1944_v42 }
  0xbe   : > { %497 = vst.msk [vmem:[#allocation2 + $0x180] sm:$0xfe] %vm482_vm8, %v3736_v2  ;;  %v3837_v42 = vld [vmem:[%s3185_s9 + $0x88] sm:$0xff] }
  0xbf   : > { %770 = vrot.lane.b32.xlu1 %v3590_v39, %s3082_s10  ;;  %1167 = vst.msk [vmem:[#allocation2 + $0x1a0] sm:$0xff] %vm250_vm1, %v3837_v42 }
  0xc1   : > { %v1486_v14 = vpop.permute.xlu1 %1485  ;;  %v1852_v11 = vld [vmem:[#allocation2 + $0x48] sm:$0xff]  ;;  %772 = vrot.lane.b32.xlu2 %v703_v28, %s3082_s10  ;;  %v2738_v28 = vld [vmem:[%s3185_s9 + $0x78] sm:$0x7f] }
  0xc2   : > { %591 = vrot.lane.b32.xlu0 %v3384_v51, %s3080_s21  ;;  %1574 = vst.msk [vmem:[#allocation2 + $0x38] sm:$0xfe] %vm1571_vm4, %v1486_v14  ;;  %v413_v14 = vrot.slane %v350_v37, 7  ;;  %v417_v51 = vsel %vm405_vm0, %v3295_v34, %v416_v7  ;;  %v1197_v37 = vld [vmem:[%s3185_s9 + $0x79] sm:$0x7f] }
  0xc3   : > { %v1255_v5 = vpop.permute.xlu2 %1254  ;;  %490 = vst.msk [vmem:[#allocation2 + $0xd8] sm:$0xff] %vm250_vm1, %v417_v51  ;;  %v2794_v7 = vld [vmem:[%s3185_s9 + $0x59] sm:$0x7f] }
  0xc4   : > { %v1253_v45 = vpop.permute.xlu0 %1252  ;;  %v1849_v13 = vld [vmem:[#allocation2 + $0x30] sm:$0xff]  ;;  %1347 = vst.msk [vmem:[#allocation2 + $0x68] sm:$0xff] %vm663_vm2, %v1255_v5  ;;  %v414_v25 = vsel %vm405_vm0, %v3252_v21, %v413_v14  ;;  %v1453_v21 = vsel %vm405_vm0, %v3645_v1, %v1452_v53 }
  0xc5   : > { %1346 = vst.msk [vmem:[#allocation2 + $0x50] sm:$0x7f] %vm1343_vm5, %v1253_v45  ;;  %v1942_v12 = vpack.c.bf16 %v1852_v11, %v1849_v13  ;;  %v1863_v11 = vld [vmem:[#allocation2 + $0xa0] sm:$0xff]  ;;  %v1866_v13 = vld [vmem:[#allocation2 + $0xb8] sm:$0xff] }
  0xc6   : > { %1575 = vst.msk [vmem:[#allocation2 + $0x50] sm:$0xff] %vm844_vm7, %v1488_v50  ;;  %v1950_v15 = vpack.c.bf16 %v1866_v13, %v1863_v11  ;;  %v1869_v11 = vld [vmem:[#allocation2 + $0xd0] sm:$0xff] }
  0xc7   : > { %1010 = vrot.lane.b32.xlu1 %v957_v49, %s3081_s28  ;;  %2196 = vmatmul.bf16.gmra.mxu0 %v1942_v12  ;;  %v2790_v49 = vld [vmem:[%s3185_s9 + $0x39] sm:$0x7f]  ;;  %488 = vst.msk [vmem:[#allocation2 + $0xa8] sm:$0xff] %vm250_vm1, %v414_v25  ;;  %v707_v25 = vld [vmem:[%s3185_s9 + $0x69] sm:$0x7f] }
  0xc8   : > { %1818 = vst.msk [vmem:[#allocation2 + $0x88] sm:$0x7f] %vm1813_vm9, %v2790_v49 }
  0xc9   : > { %v1669_v59 = vpop.permute.xlu1 %1668  ;;  %1266 = vrot.lane.b32.xlu2 %v3689_v31, %s3080_s21  ;;  %1822 = vst.msk [vmem:[#allocation2 + $0xe8] sm:$0x7f] %vm1813_vm9, %v2794_v7 }
  0xca   : > { %1008 = vrot.lane.b32.xlu0 %v3536_v24, %s3081_s28  ;;  %1755 = vst.msk [vmem:[#allocation2 + $0x50] sm:$0xff] %vm1086_vm6, %v1669_v59  ;;  %v1857_v59 = vld [vmem:[#allocation2 + $0x70] sm:$0xff] }
  0xcb   : > { %v1492_v45 = vpop.permute.xlu2 %1491 }
  0xcc   : > { %v1667_v60 = vpop.permute.xlu0 %1666 }
  0xcd   : > { %1754 = vst.msk [vmem:[#allocation2 + $0x38] sm:$0xff] %vm1086_vm6, %v1667_v60 }
  0xcf   : > { %1501 = vrot.lane.b32.xlu1 %v3645_v1, %s3082_s10  ;;  %v1860_v60 = vld [vmem:[#allocation2 + $0x88] sm:$0xff] }
  0xd1   : > { %v759_v9 = vpop.permute.xlu1 %758  ;;  %v1853_v48 = vld [vmem:[#allocation2 + $0x50] sm:$0xff]  ;;  %1503 = vrot.lane.b32.xlu2 %v1453_v21, %s3082_s10 }
  0xd2   : > { %1268 = vrot.lane.b32.xlu0 %v1193_v61, %s3080_s21  ;;  %848 = vst.msk [vmem:[#allocation2 + $0x60] sm:$0xff] %vm844_vm7, %v759_v9  ;;  %v1947_v61 = vpack.c.bf16 %v1860_v60, %v1857_v59 }
  0xd3   : > { %v582_v58 = vpop.permute.xlu2 %581 }
  0xd4   : > { %v580_v10 = vpop.permute.xlu0 %579  ;;  %v1850_v29 = vld [vmem:[#allocation2 + $0x38] sm:$0xff]  ;;  %668 = vst.msk [vmem:[#allocation2 + $0x90] sm:$0xff] %vm663_vm2, %v582_v58  ;;  %2889 = vmatmul.msk.bf16.gmra.mxu2 %vm250_vm1, %v1947_v61  ;;  %v2740_v61 = vld [vmem:[%s3185_s9 + $0x88] sm:$0x7f] }
  0xd5   : > { %667 = vst.msk [vmem:[#allocation2 + $0x78] sm:$0xff] %vm663_vm2, %v580_v10  ;;  %v1943_v32 = vpack.c.bf16 %v1853_v48, %v1850_v29  ;;  %v705_v10 = vld [vmem:[%s3185_s9 + $0x59] sm:$0x7f]  ;;  %v3809_v29 = vld [vmem:[%s3185_s9 + $0x71] sm:$0xff] }
  0xd6   : > { %849 = vst.msk [vmem:[#allocation2 + $0x78] sm:$0x7f] %vm846_vm10, %v761_v17  ;;  %v3793_v17 = vld [vmem:[%s3185_s9 + $0x40] sm:$0xff] }
  0xd7   : > { %1684 = vrot.lane.b32.xlu1 %v3666_v16, %s3081_s28  ;;  %2285 = vmatmul.bf16.gmra.mxu1 %v1943_v32  ;;  %1158 = vst.msk [vmem:[#allocation2 + $0xc8] sm:$0xff] %vm250_vm1, %v3793_v17  ;;  %v3822_v32 = vld [vmem:[%s3185_s9 + $0x80] sm:$0xff] }
  0xd8   : > { %1825 = vst.msk [vmem:[#allocation2 + $0x130] sm:$0xff] %vm250_vm1, %v3809_v29  ;;  %v3833_v40 = vrot.slane %v3822_v32, 7 }
  0xd9   : > { %v999_v26 = vpop.permute.xlu1 %998  ;;  %593 = vrot.lane.b32.xlu2 %v3530_v22, %s3080_s21  ;;  %v891_v22 = vld [vmem:[%s3185_s9 + $0x78] sm:$0x7f]  ;;  %1166 = vst.msk [vmem:[#allocation2 + $0x188] sm:$0xff] %vm250_vm1, %v3822_v32 }
  0xda   : > { %1682 = vrot.lane.b32.xlu0 %v3634_v19, %s3081_s28  ;;  %1091 = vst.msk [vmem:[#allocation2 + $0x78] sm:$0xff] %vm1086_vm6, %v999_v26  ;;  %v962_v12 = vrot.slane %v891_v22, 7 }
  0xdb   : > { %v765_v39 = vpop.permute.xlu2 %764  ;;  %499 = vst.msk [vmem:[#allocation2 + $0x1b0] sm:$0xfe] %vm482_vm8, %v3833_v40 }
  0xdc   : > { %v997_v27 = vpop.permute.xlu0 %996 }
  0xdd   : > { %1090 = vst.msk [vmem:[#allocation2 + $0x60] sm:$0xfe] %vm1084_vm3, %v997_v27 }
  0xdf   : > { %774 = vrot.lane.b32.xlu1 %v3689_v31, %s3082_s10  ;;  %v1455_v31 = vrot.slane %v2738_v28, 7 }
  0xe1   : > { %v1490_v43 = vpop.permute.xlu1 %1489  ;;  %v1858_v47 = vld [vmem:[#allocation2 + $0x78] sm:$0xff]  ;;  %776 = vrot.lane.b32.xlu2 %v705_v10, %s3082_s10  ;;  %v1456_v38 = vsel %vm405_vm0, %v3736_v2, %v1455_v31 }
  0xe2   : > { %595 = vrot.lane.b32.xlu0 %v3564_v33, %s3080_s21  ;;  %1576 = vst.msk [vmem:[#allocation2 + $0x68] sm:$0xfe] %vm1571_vm4, %v1490_v43 }
  0xe3   : > { %v1259_v33 = vpop.permute.xlu2 %1258 }
  0xe4   : > { %v1257_v44 = vpop.permute.xlu0 %1256  ;;  %v1855_v50 = vld [vmem:[#allocation2 + $0x60] sm:$0xff]  ;;  %1349 = vst.msk [vmem:[#allocation2 + $0x98] sm:$0xff] %vm663_vm2, %v1259_v33  ;;  %2890 = vmatmul.msk.bf16.gmra.mxu2 %vm250_vm1, %v1950_v15  ;;  %v1872_v33 = vld [vmem:[#allocation2 + $0xe8] sm:$0xff] }
  0xe5   : > { %1348 = vst.msk [vmem:[#allocation2 + $0x80] sm:$0x7f] %vm1343_vm5, %v1257_v44  ;;  %v1945_v52 = vpack.c.bf16 %v1858_v47, %v1855_v50 }
  0xe6   : > { %1577 = vst.msk [vmem:[#allocation2 + $0x80] sm:$0xff] %vm844_vm7, %v1492_v45 }
  0xe7   : > { %1014 = vrot.lane.b32.xlu1 %v960_v18, %s3081_s28  ;;  %2201 = vmatmul.bf16.gmra.mxu0 %v1945_v52  ;;  %v893_v52 = vld [vmem:[%s3185_s9 + $0x88] sm:$0x7f] }
  0xe8   : > { %v965_v53 = vrot.slane %v893_v52, 7 }
  0xe9   : > { %v1673_v55 = vpop.permute.xlu1 %1672  ;;  %1270 = vrot.lane.b32.xlu2 %v706_v4, %s3080_s21 }
  0xea   : > { %1012 = vrot.lane.b32.xlu0 %v3645_v1, %s3081_s28  ;;  %1757 = vst.msk [vmem:[#allocation2 + $0x80] sm:$0xff] %vm1086_vm6, %v1673_v55  ;;  %v966_v59 = vsel %vm405_vm0, %v3833_v40, %v965_v53  ;;  %v1875_v53 = vld [vmem:[#allocation2 + $0x100] sm:$0xff] }
  0xeb   : > { %v1496_v5 = vpop.permute.xlu2 %1495 }
  0xec   : > { %v1671_v56 = vpop.permute.xlu0 %1670 }
  0xed   : > { %1756 = vst.msk [vmem:[#allocation2 + $0x68] sm:$0xff] %vm1086_vm6, %v1671_v56 }
  0xef   : > { %1505 = vrot.lane.b32.xlu1 %v3736_v2, %s3082_s10 }
  0xf1   : > { %v763_v30 = vpop.permute.xlu1 %762  ;;  %v1859_v63 = vld [vmem:[#allocation2 + $0x80] sm:$0xff]  ;;  %1507 = vrot.lane.b32.xlu2 %v1456_v38, %s3082_s10 }
  0xf2   : > { %1272 = vrot.lane.b32.xlu0 %v1195_v57, %s3080_s21  ;;  %850 = vst.msk [vmem:[#allocation2 + $0x90] sm:$0xff] %vm844_vm7, %v763_v30  ;;  %v3879_v30 = vld [vmem:[%s3185_s9 + $0x90] sm:$0xff] }
  0xf3   : > { %v586_v43 = vpop.permute.xlu2 %585  ;;  %1168 = vst.msk [vmem:[#allocation2 + $0x1b8] sm:$0xff] %vm250_vm1, %v3879_v30 }
  0xf4   : > { %v584_v62 = vpop.permute.xlu0 %583  ;;  %v1856_v41 = vld [vmem:[#allocation2 + $0x68] sm:$0xff]  ;;  %670 = vst.msk [vmem:[#allocation2 + $0xc0] sm:$0xff] %vm663_vm2, %v586_v43 }
  0xf5   : > { %669 = vst.msk [vmem:[#allocation2 + $0xa8] sm:$0xff] %vm663_vm2, %v584_v62  ;;  %v1946_v6 = vpack.c.bf16 %v1859_v63, %v1856_v41  ;;  %v418_v62 = vrot.slane %v3793_v17, 7  ;;  %v1458_v41 = vrot.slane %v2740_v61, 7  ;;  %v1953_v17 = vpack.c.bf16 %v1872_v33, %v1869_v11 }
  0xf6   : > { %851 = vst.msk [vmem:[#allocation2 + $0xa8] sm:$0x7f] %vm846_vm10, %v765_v39  ;;  %v3891_v39 = vrot.slane %v3879_v30, 7 }
  0xf7   : > { %2290 = vmatmul.bf16.gmra.mxu1 %v1946_v6  ;;  %1688 = vrot.lane.b32.xlu1 %v3759_v8, %s3081_s28  ;;  %v354_v6 = vld [vmem:[%s3185_s9 + $0x48] sm:$0x7f]  ;;  %v1459_v51 = vsel %vm405_vm0, %v3833_v40, %v1458_v41  ;;  %491 = vst.msk [vmem:[#allocation2 + $0xf0] sm:$0xfe] %vm482_vm8, %v418_v62 }
  0xf8   : > { %501 = vst.msk [vmem:[#allocation2 + $0x1e0] sm:$0xfe] %vm482_vm8, %v3891_v39  ;;  %2891 = vmatmul.msk.bf16.gmra.mxu2 %vm250_vm1, %v1953_v17 }
  0xf9   : > { %v1003_v9 = vpop.permute.xlu1 %1002  ;;  %597 = vrot.lane.b32.xlu2 %v3634_v19, %s3080_s21 }
  0xfa   : > { %1686 = vrot.lane.b32.xlu0 %v3726_v54, %s3081_s28  ;;  %1093 = vst.msk [vmem:[#allocation2 + $0xa8] sm:$0xff] %vm1086_vm6, %v1003_v9 }
  0xfb   : > { %v769_v47 = vpop.permute.xlu2 %768 }
  0xfc   : > { %v1001_v34 = vpop.permute.xlu0 %1000 }
  0xfd   : > { %1092 = vst.msk [vmem:[#allocation2 + $0x90] sm:$0xfe] %vm1084_vm3, %v1001_v34 }
  0xff   : > { %778 = vrot.lane.b32.xlu1 %v706_v4, %s3082_s10 }
 0x101   : > { %v1494_v20 = vpop.permute.xlu1 %1493  ;;  %v1864_v26 = vld [vmem:[#allocation2 + $0xa8] sm:$0xff]  ;;  %780 = vrot.lane.b32.xlu2 %v707_v25, %s3082_s10 }
 0x102   : > { %599 = vrot.lane.b32.xlu0 %v3666_v16, %s3080_s21  ;;  %1578 = vst.msk [vmem:[#allocation2 + $0x98] sm:$0xfe] %vm1571_vm4, %v1494_v20  ;;  %v963_v16 = vsel %vm405_vm0, %v3736_v2, %v962_v12  ;;  %v3914_v12 = vld [vmem:[%s3185_s9 + $0x98] sm:$0xff] }
 0x103   : > { %v1263_v19 = vpop.permute.xlu2 %1262  ;;  %1169 = vst.msk [vmem:[#allocation2 + $0x1d0] sm:$0xff] %vm250_vm1, %v3914_v12 }
 0x104   : > { %v1261_v23 = vpop.permute.xlu0 %1260  ;;  %v1861_v27 = vld [vmem:[#allocation2 + $0x90] sm:$0xff]  ;;  %1351 = vst.msk [vmem:[#allocation2 + $0xc8] sm:$0xff] %vm663_vm2, %v1263_v19 }
 0x105   : > { %1350 = vst.msk [vmem:[#allocation2 + $0xb0] sm:$0x7f] %vm1343_vm5, %v1261_v23  ;;  %v1948_v48 = vpack.c.bf16 %v1864_v26, %v1861_v27  ;;  %v710_v27 = vld [vmem:[%s3185_s9 + $0x81] sm:$0xff] }
 0x106   : > { %1579 = vst.msk [vmem:[#allocation2 + $0xb0] sm:$0xff] %vm844_vm7, %v1496_v5 }
 0x107   : > { %2206 = vmatmul.bf16.gmra.mxu0 %v1948_v48  ;;  %1018 = vrot.lane.b32.xlu1 %v963_v16, %s3081_s28  ;;  %v895_v48 = vld [vmem:[%s3185_s9 + $0x98] sm:$0x7f]  ;;  %1827 = vst.msk [vmem:[#allocation2 + $0x160] sm:$0xff] %vm250_vm1, %v710_v27 }
 0x108   : > { %v968_v5 = vrot.slane %v895_v48, 7 }
 0x109   : > { %v1677_v35 = vpop.permute.xlu1 %1676  ;;  %1274 = vrot.lane.b32.xlu2 %v3809_v29, %s3080_s21 }
 0x10a   : > { %1016 = vrot.lane.b32.xlu0 %v3736_v2, %s3081_s28  ;;  %1759 = vst.msk [vmem:[#allocation2 + $0xb0] sm:$0xff] %vm1086_vm6, %v1677_v35  ;;  %v3933_v35 = vld [vmem:[%s3185_s9 + $0xa0] sm:$0xff] }
 0x10b   : > { %v1500_v60 = vpop.permute.xlu2 %1499  ;;  %v3942_v43 = vrot.slane %v3933_v35, 7  ;;  %1170 = vst.msk [vmem:[#allocation2 + $0x1e8] sm:$0xff] %vm250_vm1, %v3933_v35 }
 0x10c   : > { %v1675_v36 = vpop.permute.xlu0 %1674 }
 0x10d   : > { %1758 = vst.msk [vmem:[#allocation2 + $0x98] sm:$0xff] %vm1086_vm6, %v1675_v36 }
 0x10e   : > { %503 = vst.msk [vmem:[#allocation2 + $0x210] sm:$0xfe] %vm482_vm8, %v3942_v43 }
 0x10f   : > { %1509 = vrot.lane.b32.xlu1 %v3833_v40, %s3082_s10 }
 0x111   : > { %v767_v44 = vpop.permute.xlu1 %766  ;;  %v1865_v18 = vld [vmem:[#allocation2 + $0xb0] sm:$0xff]  ;;  %1511 = vrot.lane.b32.xlu2 %v1459_v51, %s3082_s10  ;;  %v358_v51 = vld [vmem:[%s3185_s9 + $0x68] sm:$0x7f] }
 0x112   : > { %1276 = vrot.lane.b32.xlu0 %v1197_v37, %s3080_s21  ;;  %852 = vst.msk [vmem:[#allocation2 + $0xc0] sm:$0xff] %vm844_vm7, %v767_v44  ;;  %v2796_v37 = vld [vmem:[%s3185_s9 + $0x69] sm:$0x7f] }
 0x113   : > { %v590_v34 = vpop.permute.xlu2 %589  ;;  %1824 = vst.msk [vmem:[#allocation2 + $0x118] sm:$0x7f] %vm1813_vm9, %v2796_v37 }
 0x114   : > { %v588_v14 = vpop.permute.xlu0 %587  ;;  %v1862_v45 = vld [vmem:[#allocation2 + $0x98] sm:$0xff]  ;;  %672 = vst.msk [vmem:[#allocation2 + $0xf0] sm:$0xff] %vm663_vm2, %v590_v34 }
 0x115   : > { %671 = vst.msk [vmem:[#allocation2 + $0xd8] sm:$0xff] %vm663_vm2, %v588_v14  ;;  %v1949_v46 = vpack.c.bf16 %v1865_v18, %v1862_v45  ;;  %v3948_v14 = vld [vmem:[%s4649_s2] ss:$0 sm:$0xff]  ;;  %v969_v18 = vsel %vm405_vm0, %v3891_v39, %v968_v5  ;;  %v2742_v45 = vld [vmem:[%s3185_s9 + $0x98] sm:$0x7f] }
 0x116   : > { %853 = vst.msk [vmem:[#allocation2 + $0xd8] sm:$0x7f] %vm846_vm10, %v769_v47  ;;  %v1461_v19 = vrot.slane %v2742_v45, 7  ;;  %v712_v34 = vld [vmem:[%s3185_s9 + $0x91] sm:$0xff] }
 0x117   : > { %2295 = vmatmul.bf16.gmra.mxu1 %v1949_v46  ;;  %1692 = vrot.lane.b32.xlu1 %v3837_v42, %s3081_s28  ;;  %1829 = vst.msk [vmem:[#allocation2 + $0x190] sm:$0xff] %vm250_vm1, %v712_v34 }
 0x119   : > { %v1007_v49 = vpop.permute.xlu1 %1006  ;;  %601 = vrot.lane.b32.xlu2 %v3726_v54, %s3080_s21  ;;  %v709_v54 = vld [vmem:[%s3185_s9 + $0x79] sm:$0x7f] }
 0x11a   : > { %1690 = vrot.lane.b32.xlu0 %v3822_v32, %s3081_s28  ;;  %1095 = vst.msk [vmem:[#allocation2 + $0xd8] sm:$0xff] %vm1086_vm6, %v1007_v49 }
 0x11b   : > { %v773_v20 = vpop.permute.xlu2 %772 }
 0x11c   : > { %v1005_v50 = vpop.permute.xlu0 %1004 }
 0x11d   : > { %1094 = vst.msk [vmem:[#allocation2 + $0xc0] sm:$0xfe] %vm1084_vm3, %v1005_v50 }
 0x11f   : > { %782 = vrot.lane.b32.xlu1 %v3809_v29, %s3082_s10 }
 0x121   : > { %v1498_v55 = vpop.permute.xlu1 %1497  ;;  %v1870_v57 = vld [vmem:[#allocation2 + $0xd8] sm:$0xff]  ;;  %784 = vrot.lane.b32.xlu2 %v709_v54, %s3082_s10 }
 0x122   : > { %603 = vrot.lane.b32.xlu0 %v3759_v8, %s3080_s21  ;;  %1580 = vst.msk [vmem:[#allocation2 + $0xc8] sm:$0xfe] %vm1571_vm4, %v1498_v55  ;;  %v419_v8 = vrot.slane %v354_v6, 7 }
 0x123   : > { %v1267_v16 = vpop.permute.xlu2 %1266 }
 0x124   : > { %v1265_v56 = vpop.permute.xlu0 %1264  ;;  %v1867_v21 = vld [vmem:[#allocation2 + $0xc0] sm:$0xff]  ;;  %v420_v9 = vsel %vm405_vm0, %v418_v62, %v419_v8  ;;  %1353 = vst.msk [vmem:[#allocation2 + $0xf8] sm:$0xff] %vm663_vm2, %v1267_v16  ;;  %v2798_v8 = vld [vmem:[%s3185_s9 + $0x79] sm:$0x7f] }
 0x125   : > { %1352 = vst.msk [vmem:[#allocation2 + $0xe0] sm:$0x7f] %vm1343_vm5, %v1265_v56  ;;  %v1951_v58 = vpack.c.bf16 %v1870_v57, %v1867_v21  ;;  %v1878_v57 = vld [vmem:[#allocation2 + $0x118] sm:$0xff]  ;;  %v3968_v21 = vld [vmem:[%s3185_s9 + $0xa8] sm:$0xff] }
 0x126   : > { %1581 = vst.msk [vmem:[#allocation2 + $0xe0] sm:$0xff] %vm844_vm7, %v1500_v60 }
 0x127   : > { %2211 = vmatmul.bf16.gmra.mxu0 %v1951_v58  ;;  %1022 = vrot.lane.b32.xlu1 %v966_v59, %s3081_s28  ;;  %492 = vst.msk [vmem:[#allocation2 + $0x108] sm:$0xff] %vm250_vm1, %v420_v9  ;;  %v1956_v58 = vpack.c.bf16 %v1878_v57, %v1875_v53  ;;  %v1462_v59 = vsel %vm405_vm0, %v3891_v39, %v1461_v19  ;;  %v1203_v19 = vld [vmem:[%s3185_s9 + $0xa9] sm:$0x7f] }
 0x128   : > { %1171 = vst.msk [vmem:[#allocation2 + $0x200] sm:$0xff] %vm250_vm1, %v3968_v21 }
 0x129   : > { %v1681_v63 = vpop.permute.xlu1 %1680  ;;  %1278 = vrot.lane.b32.xlu2 %v710_v27, %s3080_s21  ;;  %2892 = vmatmul.msk.bf16.gmra.mxu2 %vm250_vm1, %v1956_v58  ;;  %1826 = vst.msk [vmem:[#allocation2 + $0x148] sm:$0x7f] %vm1813_vm9, %v2798_v8 }
 0x12a   : > { %1020 = vrot.lane.b32.xlu0 %v3833_v40, %s3081_s28  ;;  %1761 = vst.msk [vmem:[#allocation2 + $0xe0] sm:$0xff] %vm1086_vm6, %v1681_v63 }
 0x12b   : > { %v1504_v49 = vpop.permute.xlu2 %1503 }
 0x12c   : > { %v1679_v0 = vpop.permute.xlu0 %1678  ;;  %v2192_v47 = vpop.f32.mrf.mxu0 }
 0x12d   : > { %1760 = vst.msk [vmem:[#allocation2 + $0xc8] sm:$0xff] %vm1086_vm6, %v1679_v0  ;;  %v2193_v50 = vadd.f32 %v3948_v14, %v2192_v47  ;;  %v2370_v6 = vpop.f32.mrf.mxu2 }
 0x12f   : > { %1513 = vrot.lane.b32.xlu1 %v3891_v39, %s3082_s10 }
 0x131   : > { %v771_v10 = vpop.permute.xlu1 %770  ;;  %v1871_v22 = vld [vmem:[#allocation2 + $0xe0] sm:$0xff]  ;;  %1515 = vrot.lane.b32.xlu2 %v1462_v59, %s3082_s10 }
 0x132   : > { %1280 = vrot.lane.b32.xlu0 %v1199_v3, %s3080_s21  ;;  %854 = vst.msk [vmem:[#allocation2 + $0xf0] sm:$0xff] %vm844_vm7, %v771_v10  ;;  %v425_v10 = vrot.slane %v358_v51, 7 }
 0x133   : > { %v594_v61 = vpop.permute.xlu2 %593 }
 0x134   : > { %v592_v4 = vpop.permute.xlu0 %591  ;;  %v1868_v13 = vld [vmem:[#allocation2 + $0xc8] sm:$0xff]  ;;  %v2281_v55 = vpop.f32.mrf.mxu1  ;;  %674 = vst.msk [vmem:[#allocation2 + $0x120] sm:$0xff] %vm663_vm2, %v594_v61  ;;  %v426_v11 = vsel %vm405_vm0, %v3645_v1, %v425_v10  ;;  %v1881_v1 = vld [vmem:[#allocation2 + $0x130] sm:$0xff] }
 0x135   : > { %673 = vst.msk [vmem:[#allocation2 + $0x108] sm:$0xff] %vm663_vm2, %v592_v4  ;;  %v1952_v15 = vpack.c.bf16 %v1871_v22, %v1868_v13  ;;  %v2282_v56 = vadd.f32 %v2281_v55, %v2193_v50  ;;  %v3976_v60 = vpop.f32.mrf.mxu0  ;;  %v3995_v4 = vld [vmem:[%s3185_s9 + $0xb0] sm:$0xff]  ;;  %v4024_v16 = vpop.f32.mrf.mxu2 }
 0x136   : > { %855 = vst.msk [vmem:[#allocation2 + $0x108] sm:$0x7f] %vm846_vm10, %v773_v20  ;;  %v4015_v20 = vld [vmem:[%s3185_s9 + $0xb8] sm:$0xff] }
 0x137   : > { %2300 = vmatmul.bf16.gmra.mxu1 %v1952_v15  ;;  %1696 = vrot.lane.b32.xlu1 %v3914_v12, %s3081_s28  ;;  %v3990_v9 = vadd.f32 %v2370_v6, %v2282_v56  ;;  %1172 = vst.msk [vmem:[#allocation2 + $0x218] sm:$0xff] %vm250_vm1, %v3995_v4  ;;  %v360_v6 = vld [vmem:[%s3185_s9 + $0x78] sm:$0x7f] }
 0x138   : > { %496 = vst.msk [vmem:[#allocation2 + $0x168] sm:$0xff] %vm250_vm1, %v426_v11 }
 0x139   : > { %v1011_v23 = vpop.permute.xlu1 %1010  ;;  %605 = vrot.lane.b32.xlu2 %v3822_v32, %s3080_s21  ;;  %v4012_v32 = vrot.slane %v3995_v4, 7  ;;  %1173 = vst.msk [vmem:[#allocation2 + $0x230] sm:$0xff] %vm250_vm1, %v4015_v20 }
 0x13a   : > { %1694 = vrot.lane.b32.xlu0 %v3879_v30, %s3081_s28  ;;  %1097 = vst.msk [vmem:[#allocation2 + $0x108] sm:$0xff] %vm1086_vm6, %v1011_v23 }
 0x13b   : > { %v777_v22 = vpop.permute.xlu2 %776  ;;  %505 = vst.msk [vmem:[#allocation2 + $0x240] sm:$0xfe] %vm482_vm8, %v4012_v32 }
 0x13c   : > { %v1009_v26 = vpop.permute.xlu0 %1008  ;;  %v3984_v7 = vpop.f32.mrf.mxu1 }
 0x13d   : > { %1096 = vst.msk [vmem:[#allocation2 + $0xf0] sm:$0xfe] %vm1084_vm3, %v1009_v26  ;;  %v1884_v26 = vld [vmem:[#allocation2 + $0x148] sm:$0xff] }
 0x13e   : > { %v1959_v48 = vpack.c.bf16 %v1884_v26, %v1881_v1  ;;  %v1887_v1 = vld [vmem:[#allocation2 + $0x160] sm:$0xff]  ;;  %v713_v26 = vld [vmem:[%s3185_s9 + $0x99] sm:$0x7f] }
 0x13f   : > { %786 = vrot.lane.b32.xlu1 %v710_v27, %s3082_s10  ;;  %v711_v27 = vld [vmem:[%s3185_s9 + $0x89] sm:$0x7f] }
 0x140   : > { %2893 = vmatmul.msk.bf16.gmra.mxu2 %vm250_vm1, %v1959_v48  ;;  %v2375_v45 = vpop.f32.mrf.mxu2 }
 0x141   : > { %v1502_v28 = vpop.permute.xlu1 %1501  ;;  %v1876_v31 = vld [vmem:[#allocation2 + $0x108] sm:$0xff]  ;;  %788 = vrot.lane.b32.xlu2 %v711_v27, %s3082_s10 }
 0x142   : > { %607 = vrot.lane.b32.xlu0 %v3837_v42, %s3080_s21  ;;  %1582 = vst.msk [vmem:[#allocation2 + $0xf8] sm:$0xfe] %vm1571_vm4, %v1502_v28  ;;  %v356_v42 = vld [vmem:[%s3185_s9 + $0x58] sm:$0x7f]  ;;  %v897_v28 = vld [vmem:[%s3185_s9 + $0xa8] sm:$0x7f] }
 0x143   : > { %v422_v44 = vrot.slane %v356_v42, 7  ;;  %v4034_v42 = vld [vmem:[%s3185_s9 + $0xa1] sm:$0xff] }
 0x144   : > { %v1269_v29 = vpop.permute.xlu0 %1268  ;;  %v1873_v36 = vld [vmem:[#allocation2 + $0xf0] sm:$0xff]  ;;  %v2197_v13 = vpop.f32.mrf.mxu0  ;;  %1831 = vst.msk [vmem:[#allocation2 + $0x1c0] sm:$0xff] %vm250_vm1, %v4034_v42 }
 0x145   : > { %1354 = vst.msk [vmem:[#allocation2 + $0x110] sm:$0x7f] %vm1343_vm5, %v1269_v29  ;;  %v1954_v38 = vpack.c.bf16 %v1876_v31, %v1873_v36  ;;  %v423_v46 = vsel %vm405_vm0, %v3536_v24, %v422_v44  ;;  %v1201_v24 = vld [vmem:[%s3185_s9 + $0x99] sm:$0x7f]  ;;  %v2198_v17 = vadd.f32 %v3948_v14, %v2197_v13  ;;  %v971_v36 = vrot.slane %v897_v28, 7 }
 0x146   : > { %494 = vst.msk [vmem:[#allocation2 + $0x138] sm:$0xff] %vm250_vm1, %v423_v46  ;;  %v2744_v46 = vld [vmem:[%s3185_s9 + $0xa8] sm:$0x7f] }
 0x147   : > { %2216 = vmatmul.bf16.gmra.mxu0 %v1954_v38  ;;  %1026 = vrot.lane.b32.xlu1 %v969_v18, %s3081_s28  ;;  %1583 = vst.msk [vmem:[#allocation2 + $0x110] sm:$0xff] %vm844_vm7, %v1504_v49  ;;  %v972_v44 = vsel %vm405_vm0, %v3942_v43, %v971_v36 }
 0x148   : > { %v4058_v55 = vpop.f32.mrf.mxu2 }
 0x149   : > { %v1685_v25 = vpop.permute.xlu1 %1684  ;;  %1282 = vrot.lane.b32.xlu2 %v712_v34, %s3080_s21 }
 0x14a   : > { %1024 = vrot.lane.b32.xlu0 %v3891_v39, %s3081_s28  ;;  %1763 = vst.msk [vmem:[#allocation2 + $0x110] sm:$0xff] %vm1086_vm6, %v1685_v25 }
 0x14c   : > { %v1683_v52 = vpop.permute.xlu0 %1682  ;;  %v4042_v18 = vpop.f32.mrf.mxu0 }
 0x14d   : > { %1762 = vst.msk [vmem:[#allocation2 + $0xf8] sm:$0xff] %vm1086_vm6, %v1683_v52  ;;  %v1464_v52 = vrot.slane %v2744_v46, 7 }
 0x14f   : > { %1517 = vrot.lane.b32.xlu1 %v3942_v43, %s3082_s10  ;;  %v1465_v53 = vsel %vm405_vm0, %v3942_v43, %v1464_v52 }
 0x151   : > { %v775_v62 = vpop.permute.xlu1 %774  ;;  %v1877_v0 = vld [vmem:[#allocation2 + $0x110] sm:$0xff]  ;;  %1519 = vrot.lane.b32.xlu2 %v1465_v53, %s3082_s10 }
 0x152   : > { %1284 = vrot.lane.b32.xlu0 %v1201_v24, %s3080_s21  ;;  %856 = vst.msk [vmem:[#allocation2 + $0x120] sm:$0xff] %vm844_vm7, %v775_v62 }
 0x154   : > { %v596_v63 = vpop.permute.xlu0 %595  ;;  %v1874_v41 = vld [vmem:[#allocation2 + $0xf8] sm:$0xff]  ;;  %v2286_v23 = vpop.f32.mrf.mxu1 }
 0x155   : > { %675 = vst.msk [vmem:[#allocation2 + $0x138] sm:$0xff] %vm663_vm2, %v596_v63  ;;  %v1955_v3 = vpack.c.bf16 %v1877_v0, %v1874_v41  ;;  %v2287_v54 = vadd.f32 %v2286_v23, %v2198_v17  ;;  %v2800_v63 = vld [vmem:[%s3185_s9 + $0x89] sm:$0x7f] }
 0x156   : > { %857 = vst.msk [vmem:[#allocation2 + $0x138] sm:$0x7f] %vm846_vm10, %v777_v22  ;;  %v4095_v23 = vld [vmem:[%s3185_s9 + $0xc8] sm:$0xff] }
 0x157   : > { %2305 = vmatmul.bf16.gmra.mxu1 %v1955_v3  ;;  %1700 = vrot.lane.b32.xlu1 %v3968_v21, %s3081_s28  ;;  %v4045_v47 = vadd.f32 %v2375_v45, %v2287_v54  ;;  %v4068_v3 = vld [vmem:[%s3185_s9 + $0xc0] sm:$0xff]  ;;  %1828 = vst.msk [vmem:[#allocation2 + $0x178] sm:$0x7f] %vm1813_vm9, %v2800_v63  ;;  %v2380_v13 = vpop.f32.mrf.mxu2  ;;  %v899_v54 = vld [vmem:[%s3185_s9 + $0xb8] sm:$0x7f] }
 0x158   : > { %v4076_v10 = vrot.slane %v4068_v3, 7  ;;  %1174 = vst.msk [vmem:[#allocation2 + $0x248] sm:$0xff] %vm250_vm1, %v4068_v3 }
 0x159   : > { %v1015_v33 = vpop.permute.xlu1 %1014  ;;  %609 = vrot.lane.b32.xlu2 %v3879_v30, %s3080_s21  ;;  %1175 = vst.msk [vmem:[#allocation2 + $0x260] sm:$0xff] %vm250_vm1, %v4095_v23 }
 0x15a   : > { %1698 = vrot.lane.b32.xlu0 %v3933_v35, %s3081_s28  ;;  %1099 = vst.msk [vmem:[#allocation2 + $0x138] sm:$0xff] %vm1086_vm6, %v1015_v33 }
 0x15b   : > { %507 = vst.msk [vmem:[#allocation2 + $0x270] sm:$0xfe] %vm482_vm8, %v4076_v10 }
 0x15c   : > { %v1013_v15 = vpop.permute.xlu0 %1012  ;;  %v4051_v24 = vpop.f32.mrf.mxu1 }
 0x15d   : > { %1098 = vst.msk [vmem:[#allocation2 + $0x120] sm:$0xfe] %vm1084_vm3, %v1013_v15 }
 0x15e   : > { %v1890_v17 = vld [vmem:[#allocation2 + $0x178] sm:$0xff] }
 0x15f   : > { %790 = vrot.lane.b32.xlu1 %v712_v34, %s3082_s10  ;;  %v428_v34 = vrot.slane %v360_v6, 7  ;;  %v1962_v30 = vpack.c.bf16 %v1890_v17, %v1887_v1  ;;  %v4129_v52 = vpop.f32.mrf.mxu2  ;;  %v1893_v1 = vld [vmem:[#allocation2 + $0x190] sm:$0xff] }
 0x161   : > { %v1506_v29 = vpop.permute.xlu1 %1505  ;;  %v1882_v5 = vld [vmem:[#allocation2 + $0x138] sm:$0xff]  ;;  %v429_v11 = vsel %vm405_vm0, %v3736_v2, %v428_v34  ;;  %2894 = vmatmul.msk.bf16.gmra.mxu2 %vm250_vm1, %v1962_v30  ;;  %792 = vrot.lane.b32.xlu2 %v713_v26, %s3082_s10  ;;  %v362_v34 = vld [vmem:[%s3185_s9 + $0x88] sm:$0x7f] }
 0x162   : > { %611 = vrot.lane.b32.xlu0 %v3914_v12, %s3080_s21  ;;  %v1271_v12 = vpop.permute.xlu2 %1270  ;;  %498 = vst.msk [vmem:[#allocation2 + $0x198] sm:$0xff] %vm250_vm1, %v429_v11  ;;  %v4174_v26 = vld [vmem:[%s3185_s9 + $0xd8] sm:$0xff] }
 0x163   : > { %1355 = vst.msk [vmem:[#allocation2 + $0x128] sm:$0xff] %vm663_vm2, %v1271_v12  ;;  %v974_v12 = vrot.slane %v899_v54, 7  ;;  %v901_v54 = vld [vmem:[%s3185_s9 + $0xc8] sm:$0x7f] }
 0x164   : > { %v1273_v31 = vpop.permute.xlu0 %1272  ;;  %1584 = vst.msk [vmem:[#allocation2 + $0x128] sm:$0xfe] %vm1571_vm4, %v1506_v29  ;;  %v1879_v37 = vld [vmem:[#allocation2 + $0x120] sm:$0xff]  ;;  %v2202_v56 = vpop.f32.mrf.mxu0 }
 0x165   : > { %1356 = vst.msk [vmem:[#allocation2 + $0x140] sm:$0x7f] %vm1343_vm5, %v1273_v31  ;;  %v1957_v38 = vpack.c.bf16 %v1882_v5, %v1879_v37  ;;  %v2203_v58 = vadd.f32 %v3948_v14, %v2202_v56  ;;  %v4111_v5 = vld [vmem:[%s3185_s9 + $0xb1] sm:$0xff]  ;;  %v975_v36 = vsel %vm405_vm0, %v4012_v32, %v974_v12 }
 0x166   : > { %1833 = vst.msk [vmem:[#allocation2 + $0x1f0] sm:$0xff] %vm250_vm1, %v4111_v5 }
 0x167   : > { %2221 = vmatmul.bf16.gmra.mxu0 %v1957_v38  ;;  %1030 = vrot.lane.b32.xlu1 %v972_v44, %s3081_s28  ;;  %v2746_v38 = vld [vmem:[%s3185_s9 + $0xb8] sm:$0x7f]  ;;  %v2385_v63 = vpop.f32.mrf.mxu2  ;;  %1177 = vst.msk [vmem:[#allocation2 + $0x290] sm:$0xff] %vm250_vm1, %v4174_v26 }
 0x169   : > { %v1689_v50 = vpop.permute.xlu1 %1688  ;;  %1286 = vrot.lane.b32.xlu2 %v4034_v42, %s3080_s21 }
 0x16a   : > { %1028 = vrot.lane.b32.xlu0 %v3942_v43, %s3081_s28  ;;  %v1508_v49 = vpop.permute.xlu2 %1507 }
 0x16b   : > { %1585 = vst.msk [vmem:[#allocation2 + $0x140] sm:$0xff] %vm844_vm7, %v1508_v49  ;;  %v1467_v49 = vrot.slane %v2746_v38, 7  ;;  %v4193_v38 = vld [vmem:[%s3185_s9 + $0xc1] sm:$0xff] }
 0x16c   : > { %v1687_v25 = vpop.permute.xlu0 %1686  ;;  %1765 = vst.msk [vmem:[#allocation2 + $0x140] sm:$0xff] %vm1086_vm6, %v1689_v50  ;;  %v4119_v37 = vpop.f32.mrf.mxu0  ;;  %v1205_v50 = vld [vmem:[%s3185_s9 + $0xb9] sm:$0x7f] }
 0x16d   : > { %1764 = vst.msk [vmem:[#allocation2 + $0x128] sm:$0xff] %vm1086_vm6, %v1687_v25 }
 0x16e   : > { %1835 = vst.msk [vmem:[#allocation2 + $0x220] sm:$0xff] %vm250_vm1, %v4193_v38 }
 0x16f   : > { %1521 = vrot.lane.b32.xlu1 %v4012_v32, %s3082_s10 }
 0x171   : > { %v779_v59 = vpop.permute.xlu1 %778 }
 0x172   : > { %1288 = vrot.lane.b32.xlu0 %v1203_v19, %s3080_s21  ;;  %v598_v57 = vpop.permute.xlu2 %597 }
 0x173   : > { %676 = vst.msk [vmem:[#allocation2 + $0x150] sm:$0xff] %vm663_vm2, %v598_v57  ;;  %v1883_v62 = vld [vmem:[#allocation2 + $0x140] sm:$0xff] }
 0x174   : > { %v600_v61 = vpop.permute.xlu0 %599  ;;  %858 = vst.msk [vmem:[#allocation2 + $0x150] sm:$0xff] %vm844_vm7, %v779_v59  ;;  %v2291_v0 = vpop.f32.mrf.mxu1  ;;  %v1880_v41 = vld [vmem:[#allocation2 + $0x128] sm:$0xff] }
 0x175   : > { %677 = vst.msk [vmem:[#allocation2 + $0x168] sm:$0xff] %vm663_vm2, %v600_v61  ;;  %v2292_v8 = vadd.f32 %v2291_v0, %v2203_v58  ;;  %v1958_v51 = vpack.c.bf16 %v1883_v62, %v1880_v41  ;;  %v4142_v61 = vld [vmem:[%s3185_s9 + $0xd0] sm:$0xff] }
 0x176   : > { %1176 = vst.msk [vmem:[#allocation2 + $0x278] sm:$0xff] %vm250_vm1, %v4142_v61 }
 0x177   : > { %2310 = vmatmul.bf16.gmra.mxu1 %v1958_v51  ;;  %v4083_v22 = vadd.f32 %v2380_v13, %v2292_v8  ;;  %1704 = vrot.lane.b32.xlu1 %v4015_v20, %s3081_s28  ;;  %v2802_v8 = vld [vmem:[%s3185_s9 + $0x99] sm:$0x7f]  ;;  %v4150_v51 = vrot.slane %v4142_v61, 7  ;;  %v431_v13 = vrot.slane %v362_v34, 7 }
 0x178   : > { %1830 = vst.msk [vmem:[#allocation2 + $0x1a8] sm:$0x7f] %vm1813_vm9, %v2802_v8  ;;  %v2804_v8 = vld [vmem:[%s3185_s9 + $0xa9] sm:$0x7f] }
 0x179   : > { %v1019_v33 = vpop.permute.xlu1 %1018  ;;  %509 = vst.msk [vmem:[#allocation2 + $0x2a0] sm:$0xfe] %vm482_vm8, %v4150_v51 }
 0x17a   : > { %1702 = vrot.lane.b32.xlu0 %v3995_v4, %s3081_s28  ;;  %v781_v2 = vpop.permute.xlu2 %780  ;;  %1832 = vst.msk [vmem:[#allocation2 + $0x1d8] sm:$0x7f] %vm1813_vm9, %v2804_v8 }
 0x17b   : > { %859 = vst.msk [vmem:[#allocation2 + $0x168] sm:$0x7f] %vm846_vm10, %v781_v2  ;;  %v432_v2 = vsel %vm405_vm0, %v3833_v40, %v431_v13 }
 0x17c   : > { %v1017_v15 = vpop.permute.xlu0 %1016  ;;  %1101 = vst.msk [vmem:[#allocation2 + $0x168] sm:$0xff] %vm1086_vm6, %v1019_v33  ;;  %v4127_v25 = vpop.f32.mrf.mxu1 }
 0x17d   : > { %1100 = vst.msk [vmem:[#allocation2 + $0x150] sm:$0xfe] %vm1084_vm3, %v1017_v15 }
 0x17e   : > { %500 = vst.msk [vmem:[#allocation2 + $0x1c8] sm:$0xff] %vm250_vm1, %v432_v2 }
 0x17f   : > { %794 = vrot.lane.b32.xlu1 %v4034_v42, %s3082_s10  ;;  %v1468_v42 = vsel %vm405_vm0, %v4012_v32, %v1467_v49  ;;  %v1896_v30 = vld [vmem:[#allocation2 + $0x1a8] sm:$0xff] }
 0x180   : > { %1523 = vrot.lane.b32.xlu2 %v1468_v42, %s3082_s10  ;;  %v1965_v40 = vpack.c.bf16 %v1896_v30, %v1893_v1  ;;  %v1207_v49 = vld [vmem:[%s3185_s9 + $0xc9] sm:$0x7f] }
 0x181   : > { %v1510_v48 = vpop.permute.xlu1 %1509  ;;  %v4242_v30 = vld [vmem:[%s3185_s9 + $0xe8] sm:$0xff] }
 0x182   : > { %615 = vrot.lane.b32.xlu0 %v3968_v21, %s3080_s21  ;;  %v1275_v27 = vpop.permute.xlu2 %1274  ;;  %2895 = vmatmul.msk.bf16.gmra.mxu2 %vm250_vm1, %v1965_v40  ;;  %1179 = vst.msk [vmem:[#allocation2 + $0x2c0] sm:$0xff] %vm250_vm1, %v4242_v30 }
 0x183   : > { %1357 = vst.msk [vmem:[#allocation2 + $0x158] sm:$0xff] %vm663_vm2, %v1275_v27  ;;  %v1888_v28 = vld [vmem:[#allocation2 + $0x168] sm:$0xff] }
 0x184   : > { %v1277_v21 = vpop.permute.xlu0 %1276  ;;  %1586 = vst.msk [vmem:[#allocation2 + $0x158] sm:$0xfe] %vm1571_vm4, %v1510_v48  ;;  %v1885_v29 = vld [vmem:[#allocation2 + $0x150] sm:$0xff]  ;;  %v2207_v19 = vpop.f32.mrf.mxu0 }
 0x185   : > { %1358 = vst.msk [vmem:[#allocation2 + $0x170] sm:$0x7f] %vm1343_vm5, %v1277_v21  ;;  %v1960_v31 = vpack.c.bf16 %v1888_v28, %v1885_v29  ;;  %v2208_v56 = vadd.f32 %v3948_v14, %v2207_v19  ;;  %v977_v21 = vrot.slane %v901_v54, 7 }
 0x187   : > { %2226 = vmatmul.bf16.gmra.mxu0 %v1960_v31  ;;  %1034 = vrot.lane.b32.xlu1 %v975_v36, %s3081_s28  ;;  %v978_v36 = vsel %vm405_vm0, %v4076_v10, %v977_v21 }
 0x188   : > { %613 = vrot.lane.b32.xlu2 %v3933_v35, %s3080_s21  ;;  %v715_v35 = vld [vmem:[%s3185_s9 + $0xa9] sm:$0x7f] }
 0x189   : > { %v1693_v45 = vpop.permute.xlu1 %1692 }
 0x18a   : > { %1032 = vrot.lane.b32.xlu0 %v4012_v32, %s3081_s28  ;;  %v1512_v44 = vpop.permute.xlu2 %1511 }
 0x18b   : > { %1587 = vst.msk [vmem:[#allocation2 + $0x170] sm:$0xff] %vm844_vm7, %v1512_v44  ;;  %v2748_v44 = vld [vmem:[%s3185_s9 + $0xc8] sm:$0x7f] }
 0x18c   : > { %v1691_v46 = vpop.permute.xlu0 %1690  ;;  %1767 = vst.msk [vmem:[#allocation2 + $0x170] sm:$0xff] %vm1086_vm6, %v1693_v45  ;;  %v4188_v31 = vpop.f32.mrf.mxu0 }
 0x18d   : > { %1766 = vst.msk [vmem:[#allocation2 + $0x158] sm:$0xff] %vm1086_vm6, %v1691_v46  ;;  %v1470_v46 = vrot.slane %v2748_v44, 7 }
 0x18f   : > { %1525 = vrot.lane.b32.xlu1 %v4076_v10, %s3082_s10 }
 0x190   : > { %796 = vrot.lane.b32.xlu2 %v715_v35, %s3082_s10 }
 0x191   : > { %v783_v57 = vpop.permute.xlu1 %782 }
 0x192   : > { %1292 = vrot.lane.b32.xlu0 %v1205_v50, %s3080_s21  ;;  %v602_v53 = vpop.permute.xlu2 %601 }
 0x193   : > { %678 = vst.msk [vmem:[#allocation2 + $0x180] sm:$0xff] %vm663_vm2, %v602_v53  ;;  %v1889_v59 = vld [vmem:[#allocation2 + $0x170] sm:$0xff] }
 0x194   : > { %v604_v58 = vpop.permute.xlu0 %603  ;;  %860 = vst.msk [vmem:[#allocation2 + $0x180] sm:$0xff] %vm844_vm7, %v783_v57  ;;  %v2296_v62 = vpop.f32.mrf.mxu1  ;;  %v1886_v0 = vld [vmem:[#allocation2 + $0x158] sm:$0xff] }
 0x195   : > { %679 = vst.msk [vmem:[#allocation2 + $0x198] sm:$0xff] %vm663_vm2, %v604_v58  ;;  %v2297_v41 = vadd.f32 %v2296_v62, %v2208_v56  ;;  %v1961_v6 = vpack.c.bf16 %v1889_v59, %v1886_v0  ;;  %v4214_v56 = vld [vmem:[%s3185_s9 + $0xe0] sm:$0xff]  ;;  %v4216_v57 = vpop.f32.mrf.mxu2 }
 0x196   : > { %1178 = vst.msk [vmem:[#allocation2 + $0x2a8] sm:$0xff] %vm250_vm1, %v4214_v56  ;;  %v4228_v2 = vrot.slane %v4214_v56, 7 }
 0x197   : > { %v4154_v11 = vadd.f32 %v2385_v63, %v2297_v41  ;;  %2315 = vmatmul.bf16.gmra.mxu1 %v1961_v6  ;;  %1708 = vrot.lane.b32.xlu1 %v4095_v23, %s3081_s28 }
 0x198   : > { %1290 = vrot.lane.b32.xlu2 %v4111_v5, %s3080_s21  ;;  %511 = vst.msk [vmem:[#allocation2 + $0x2d0] sm:$0xfe] %vm482_vm8, %v4228_v2 }
 0x199   : > { %v1023_v33 = vpop.permute.xlu1 %1022 }
 0x19a   : > { %1706 = vrot.lane.b32.xlu0 %v4068_v3, %s3081_s28  ;;  %v785_v17 = vpop.permute.xlu2 %784 }
 0x19b   : > { %861 = vst.msk [vmem:[#allocation2 + $0x198] sm:$0x7f] %vm846_vm10, %v785_v17 }
 0x19c   : > { %v1021_v15 = vpop.permute.xlu0 %1020  ;;  %1103 = vst.msk [vmem:[#allocation2 + $0x198] sm:$0xff] %vm1086_vm6, %v1023_v33  ;;  %v4203_v19 = vpop.f32.mrf.mxu1  ;;  %v364_v33 = vld [vmem:[%s3185_s9 + $0x98] sm:$0x7f] }
 0x19d   : > { %1102 = vst.msk [vmem:[#allocation2 + $0x180] sm:$0xfe] %vm1084_vm3, %v1021_v15  ;;  %v434_v15 = vrot.slane %v364_v33, 7  ;;  %v2390_v54 = vpop.f32.mrf.mxu2 }
 0x19f   : > { %798 = vrot.lane.b32.xlu1 %v4111_v5, %s3082_s10  ;;  %v1471_v5 = vsel %vm405_vm0, %v4076_v10, %v1470_v46  ;;  %v435_v17 = vsel %vm405_vm0, %v3891_v39, %v434_v15 }
 0x1a0   : > { %1527 = vrot.lane.b32.xlu2 %v1471_v5, %s3082_s10  ;;  %502 = vst.msk [vmem:[#allocation2 + $0x1f8] sm:$0xff] %vm250_vm1, %v435_v17  ;;  %v2806_v17 = vld [vmem:[%s3185_s9 + $0xb9] sm:$0x7f] }
 0x1a1   : > { %v1514_v27 = vpop.permute.xlu1 %1513  ;;  %1834 = vst.msk [vmem:[#allocation2 + $0x208] sm:$0x7f] %vm1813_vm9, %v2806_v17 }
 0x1a2   : > { %619 = vrot.lane.b32.xlu0 %v4015_v20, %s3080_s21  ;;  %v1279_v28 = vpop.permute.xlu2 %1278 }
 0x1a3   : > { %1359 = vst.msk [vmem:[#allocation2 + $0x188] sm:$0xff] %vm663_vm2, %v1279_v28  ;;  %v1894_v12 = vld [vmem:[#allocation2 + $0x198] sm:$0xff] }
 0x1a4   : > { %v1281_v48 = vpop.permute.xlu0 %1280  ;;  %v1891_v20 = vld [vmem:[#allocation2 + $0x180] sm:$0xff]  ;;  %1588 = vst.msk [vmem:[#allocation2 + $0x188] sm:$0xfe] %vm1571_vm4, %v1514_v27  ;;  %v2212_v53 = vpop.f32.mrf.mxu0  ;;  %v1902_v28 = vld [vmem:[#allocation2 + $0x1d8] sm:$0xff] }
 0x1a5   : > { %1360 = vst.msk [vmem:[#allocation2 + $0x1a0] sm:$0x7f] %vm1343_vm5, %v1281_v48  ;;  %v1963_v29 = vpack.c.bf16 %v1894_v12, %v1891_v20  ;;  %v2213_v62 = vadd.f32 %v3948_v14, %v2212_v53 }
 0x1a7   : > { %2231 = vmatmul.bf16.gmra.mxu0 %v1963_v29  ;;  %1038 = vrot.lane.b32.xlu1 %v978_v36, %s3081_s28  ;;  %v903_v29 = vld [vmem:[%s3185_s9 + $0xd8] sm:$0x7f] }
 0x1a8   : > { %617 = vrot.lane.b32.xlu2 %v3995_v4, %s3080_s21  ;;  %v1899_v4 = vld [vmem:[#allocation2 + $0x1c0] sm:$0xff]  ;;  %v4261_v36 = vld [vmem:[%s3185_s9 + $0xd1] sm:$0xff]  ;;  %v980_v46 = vrot.slane %v903_v29, 7 }
 0x1a9   : > { %v1697_v42 = vpop.permute.xlu1 %1696  ;;  %v1968_v12 = vpack.c.bf16 %v1902_v28, %v1899_v4  ;;  %1837 = vst.msk [vmem:[#allocation2 + $0x250] sm:$0xff] %vm250_vm1, %v4261_v36  ;;  %v4309_v4 = vld [vmem:[%s3185_s9 + $0xf8] sm:$0xff]  ;;  %v719_v28 = vld [vmem:[%s3185_s9 + $0xc9] sm:$0x7f]  ;;  %v4325_v29 = vld [vmem:[%s3185_s9 + $0xe1] sm:$0xff] }
 0x1aa   : > { %1036 = vrot.lane.b32.xlu0 %v4076_v10, %s3081_s28  ;;  %v1516_v50 = vpop.permute.xlu2 %1515  ;;  %1181 = vst.msk [vmem:[#allocation2 + $0x2f0] sm:$0xff] %vm250_vm1, %v4309_v4 }
 0x1ab   : > { %1589 = vst.msk [vmem:[#allocation2 + $0x1a0] sm:$0xff] %vm844_vm7, %v1516_v50  ;;  %2896 = vmatmul.msk.bf16.gmra.mxu2 %vm250_vm1, %v1968_v12  ;;  %v905_v12 = vld [vmem:[%s3185_s9 + $0xe8] sm:$0x7f] }
 0x1ac   : > { %v1695_v45 = vpop.permute.xlu0 %1694  ;;  %1769 = vst.msk [vmem:[#allocation2 + $0x1a0] sm:$0xff] %vm1086_vm6, %v1697_v42  ;;  %v2214_v1 = vpop.f32.mrf.mxu0 }
 0x1ad   : > { %1768 = vst.msk [vmem:[#allocation2 + $0x188] sm:$0xff] %vm1086_vm6, %v1695_v45  ;;  %v2215_v35 = vadd.f32 %v3948_v14, %v2214_v1  ;;  %v717_v14 = vld [vmem:[%s3185_s9 + $0xb9] sm:$0x7f] }
 0x1ae   : > { %1839 = vst.msk [vmem:[#allocation2 + $0x280] sm:$0xff] %vm250_vm1, %v4325_v29 }
 0x1af   : > { %1529 = vrot.lane.b32.xlu1 %v4150_v51, %s3082_s10 }
 0x1b0   : > { %800 = vrot.lane.b32.xlu2 %v717_v14, %s3082_s10 }
 0x1b1   : > { %v787_v0 = vpop.permute.xlu1 %786 }
 0x1b2   : > { %1296 = vrot.lane.b32.xlu0 %v1207_v49, %s3080_s21  ;;  %v606_v63 = vpop.permute.xlu2 %605 }
 0x1b3   : > { %680 = vst.msk [vmem:[#allocation2 + $0x1b0] sm:$0xff] %vm663_vm2, %v606_v63  ;;  %v1895_v6 = vld [vmem:[#allocation2 + $0x1a0] sm:$0xff] }
 0x1b4   : > { %v608_v58 = vpop.permute.xlu0 %607  ;;  %v1892_v59 = vld [vmem:[#allocation2 + $0x188] sm:$0xff]  ;;  %v2301_v41 = vpop.f32.mrf.mxu1  ;;  %862 = vst.msk [vmem:[#allocation2 + $0x1b0] sm:$0xff] %vm844_vm7, %v787_v0  ;;  %v1209_v0 = vld [vmem:[%s3185_s9 + $0xd9] sm:$0x7f] }
 0x1b5   : > { %681 = vst.msk [vmem:[#allocation2 + $0x1c8] sm:$0xff] %vm663_vm2, %v608_v58  ;;  %v2302_v34 = vadd.f32 %v2301_v41, %v2213_v62  ;;  %v1964_v13 = vpack.c.bf16 %v1895_v6, %v1892_v59  ;;  %v981_v58 = vsel %vm405_vm0, %v4150_v51, %v980_v46  ;;  %v2750_v59 = vld [vmem:[%s3185_s9 + $0xd8] sm:$0x7f]  ;;  %v983_v46 = vrot.slane %v905_v12, 7 }
 0x1b6   : > { %v1473_v63 = vrot.slane %v2750_v59, 7 }
 0x1b7   : > { %2320 = vmatmul.bf16.gmra.mxu1 %v1964_v13  ;;  %1712 = vrot.lane.b32.xlu1 %v4174_v26, %s3081_s28  ;;  %v4248_v27 = vadd.f32 %v2390_v54, %v2302_v34 }
 0x1b8   : > { %1294 = vrot.lane.b32.xlu2 %v4193_v38, %s3080_s21  ;;  %v1474_v8 = vsel %vm405_vm0, %v4150_v51, %v1473_v63  ;;  %v1211_v63 = vld [vmem:[%s3185_s9 + $0xe9] sm:$0x7f] }
 0x1b9   : > { %v1027_v48 = vpop.permute.xlu1 %1026 }
 0x1ba   : > { %1710 = vrot.lane.b32.xlu0 %v4142_v61, %s3081_s28  ;;  %v789_v39 = vpop.permute.xlu2 %788 }
 0x1bb   : > { %863 = vst.msk [vmem:[#allocation2 + $0x1c8] sm:$0x7f] %vm846_vm10, %v789_v39 }
 0x1bc   : > { %v1025_v40 = vpop.permute.xlu0 %1024  ;;  %v2303_v20 = vpop.f32.mrf.mxu1  ;;  %1105 = vst.msk [vmem:[#allocation2 + $0x1c8] sm:$0xff] %vm1086_vm6, %v1027_v48 }
 0x1bd   : > { %1104 = vst.msk [vmem:[#allocation2 + $0x1b0] sm:$0xfe] %vm1084_vm3, %v1025_v40  ;;  %v2304_v21 = vadd.f32 %v2303_v20, %v2215_v35  ;;  %v366_v35 = vld [vmem:[%s3185_s9 + $0xa8] sm:$0x7f] }
 0x1be   : > { %v437_v54 = vrot.slane %v366_v35, 7  ;;  %v2808_v35 = vld [vmem:[%s3185_s9 + $0xc9] sm:$0x7f] }
 0x1bf   : > { %802 = vrot.lane.b32.xlu1 %v4193_v38, %s3082_s10  ;;  %v4289_v38 = vld [vmem:[%s3185_s9 + $0xf0] sm:$0xff]  ;;  %1836 = vst.msk [vmem:[#allocation2 + $0x238] sm:$0x7f] %vm1813_vm9, %v2808_v35 }
 0x1c0   : > { %1531 = vrot.lane.b32.xlu2 %v1474_v8, %s3082_s10  ;;  %1180 = vst.msk [vmem:[#allocation2 + $0x2d8] sm:$0xff] %vm250_vm1, %v4289_v38  ;;  %v438_v39 = vsel %vm405_vm0, %v3942_v43, %v437_v54  ;;  %v1905_v43 = vld [vmem:[#allocation2 + $0x1f0] sm:$0xff]  ;;  %v4349_v8 = vrot.slane %v4289_v38, 7 }
 0x1c1   : > { %v1518_v42 = vpop.permute.xlu1 %1517  ;;  %504 = vst.msk [vmem:[#allocation2 + $0x228] sm:$0xff] %vm250_vm1, %v438_v39  ;;  %v368_v39 = vld [vmem:[%s3185_s9 + $0xb8] sm:$0x7f] }
 0x1c2   : > { %623 = vrot.lane.b32.xlu0 %v4095_v23, %s3080_s21  ;;  %v2392_v23 = vpop.f32.mrf.mxu2  ;;  %v1283_v49 = vpop.permute.xlu2 %1282 }
 0x1c3   : > { %v4266_v50 = vadd.f32 %v2392_v23, %v2304_v21  ;;  %1361 = vst.msk [vmem:[#allocation2 + $0x1b8] sm:$0xff] %vm663_vm2, %v1283_v49  ;;  %v1900_v53 = vld [vmem:[#allocation2 + $0x1c8] sm:$0xff] }
 0x1c4   : > { %v1285_v44 = vpop.permute.xlu0 %1284  ;;  %v1897_v45 = vld [vmem:[#allocation2 + $0x1b0] sm:$0xff]  ;;  %1590 = vst.msk [vmem:[#allocation2 + $0x1b8] sm:$0xfe] %vm1571_vm4, %v1518_v42  ;;  %v1908_v21 = vld [vmem:[#allocation2 + $0x208] sm:$0xff] }
 0x1c5   : > { %1362 = vst.msk [vmem:[#allocation2 + $0x1d0] sm:$0x7f] %vm1343_vm5, %v1285_v44  ;;  %v1966_v5 = vpack.c.bf16 %v1900_v53, %v1897_v45  ;;  %v1971_v14 = vpack.c.bf16 %v1908_v21, %v1905_v43  ;;  %v984_v53 = vsel %vm405_vm0, %v4228_v2, %v983_v46 }
 0x1c7   : > { %2236 = vmatmul.bf16.gmra.mxu0 %v1966_v5  ;;  %1042 = vrot.lane.b32.xlu1 %v981_v58, %s3081_s28  ;;  %v2752_v5 = vld [vmem:[%s3185_s9 + $0xe8] sm:$0x7f]  ;;  %v4337_v58 = vpop.f32.mrf.mxu0 }
 0x1c8   : > { %621 = vrot.lane.b32.xlu2 %v4068_v3, %s3080_s21  ;;  %2897 = vmatmul.msk.bf16.gmra.mxu2 %vm250_vm1, %v1971_v14  ;;  %v1911_v14 = vld [vmem:[#allocation2 + $0x220] sm:$0xff] }
 0x1c9   : > { %v1701_v6 = vpop.permute.xlu1 %1700 }
 0x1ca   : > { %1040 = vrot.lane.b32.xlu0 %v4150_v51, %s3081_s28  ;;  %v1520_v41 = vpop.permute.xlu2 %1519 }
 0x1cb   : > { %1591 = vst.msk [vmem:[#allocation2 + $0x1d0] sm:$0xff] %vm844_vm7, %v1520_v41  ;;  %v4344_v41 = vpop.f32.mrf.mxu2 }
 0x1cc   : > { %v1699_v62 = vpop.permute.xlu0 %1698  ;;  %1771 = vst.msk [vmem:[#allocation2 + $0x1d0] sm:$0xff] %vm1086_vm6, %v1701_v6 }
 0x1cd   : > { %1770 = vst.msk [vmem:[#allocation2 + $0x1b8] sm:$0xff] %vm1086_vm6, %v1699_v62  ;;  %v1476_v62 = vrot.slane %v2752_v5, 7 }
 0x1cf   : > { %1533 = vrot.lane.b32.xlu1 %v4228_v2, %s3082_s10 }
 0x1d0   : > { %804 = vrot.lane.b32.xlu2 %v719_v28, %s3082_s10 }
 0x1d1   : > { %v791_v15 = vpop.permute.xlu1 %790 }
 0x1d2   : > { %1300 = vrot.lane.b32.xlu0 %v1209_v0, %s3080_s21  ;;  %v610_v33 = vpop.permute.xlu2 %609 }
 0x1d3   : > { %682 = vst.msk [vmem:[#allocation2 + $0x1e0] sm:$0xff] %vm663_vm2, %v610_v33  ;;  %v1901_v1 = vld [vmem:[#allocation2 + $0x1d0] sm:$0xff] }
 0x1d4   : > { %v612_v34 = vpop.permute.xlu0 %611  ;;  %v1898_v13 = vld [vmem:[#allocation2 + $0x1b8] sm:$0xff]  ;;  %864 = vst.msk [vmem:[#allocation2 + $0x1e0] sm:$0xff] %vm844_vm7, %v791_v15  ;;  %v4359_v15 = vpop.f32.mrf.mxu0 }
 0x1d5   : > { %683 = vst.msk [vmem:[#allocation2 + $0x1f8] sm:$0xff] %vm663_vm2, %v612_v34  ;;  %v1967_v40 = vpack.c.bf16 %v1901_v1, %v1898_v13  ;;  %v4354_v34 = vpop.f32.mrf.mxu1 }
 0x1d7   : > { %2325 = vmatmul.bf16.gmra.mxu1 %v1967_v40  ;;  %1716 = vrot.lane.b32.xlu1 %v4242_v30, %s3081_s28 }
 0x1d8   : > { %1298 = vrot.lane.b32.xlu2 %v4261_v36, %s3080_s21 }
 0x1d9   : > { %v1031_v3 = vpop.permute.xlu1 %1030 }
 0x1da   : > { %1714 = vrot.lane.b32.xlu0 %v4214_v56, %s3081_s28  ;;  %v793_v20 = vpop.permute.xlu2 %792 }
 0x1db   : > { %865 = vst.msk [vmem:[#allocation2 + $0x1f8] sm:$0x7f] %vm846_vm10, %v793_v20  ;;  %v440_v20 = vrot.slane %v368_v39, 7 }
 0x1dc   : > { %v1029_v48 = vpop.permute.xlu0 %1028  ;;  %1107 = vst.msk [vmem:[#allocation2 + $0x1f8] sm:$0xff] %vm1086_vm6, %v1031_v3 }
 0x1dd   : > { %1106 = vst.msk [vmem:[#allocation2 + $0x1e0] sm:$0xfe] %vm1084_vm3, %v1029_v48  ;;  %v4368_v48 = vpop.f32.mrf.mxu2  ;;  %v441_v43 = vsel %vm405_vm0, %v4012_v32, %v440_v20  ;;  %v4373_v3 = vpop.f32.mrf.mxu1 }
 0x1de   : > { %506 = vst.msk [vmem:[#allocation2 + $0x258] sm:$0xff] %vm250_vm1, %v441_v43 }
 0x1df   : > { %806 = vrot.lane.b32.xlu1 %v4261_v36, %s3082_s10  ;;  %v1477_v36 = vsel %vm405_vm0, %v4228_v2, %v1476_v62 }
 0x1e0   : > { %1535 = vrot.lane.b32.xlu2 %v1477_v36, %s3082_s10 }
 0x1e1   : > { %v1522_v23 = vpop.permute.xlu1 %1521 }
 0x1e2   : > { %627 = vrot.lane.b32.xlu0 %v4174_v26, %s3080_s21  ;;  %v1287_v26 = vpop.permute.xlu2 %1286 }
 0x1e3   : > { %1363 = vst.msk [vmem:[#allocation2 + $0x1e8] sm:$0xff] %vm663_vm2, %v1287_v26  ;;  %v1906_v49 = vld [vmem:[#allocation2 + $0x1f8] sm:$0xff] }
 0x1e4   : > { %v1289_v44 = vpop.permute.xlu0 %1288  ;;  %v1903_v45 = vld [vmem:[#allocation2 + $0x1e0] sm:$0xff]  ;;  %1592 = vst.msk [vmem:[#allocation2 + $0x1e8] sm:$0xfe] %vm1571_vm4, %v1522_v23  ;;  %v4380_v21 = vpop.f32.mrf.mxu0 }
 0x1e5   : > { %1364 = vst.msk [vmem:[#allocation2 + $0x200] sm:$0x7f] %vm1343_vm5, %v1289_v44  ;;  %v1969_v42 = vpack.c.bf16 %v1906_v49, %v1903_v45  ;;  %v4387_v12 = vpop.f32.mrf.mxu2  ;;  %v907_v45 = vld [vmem:[%s3185_s9 + $0xf8] sm:$0x7f] }
 0x1e7   : > { %2241 = vmatmul.bf16.gmra.mxu0 %v1969_v42  ;;  %1046 = vrot.lane.b32.xlu1 %v984_v53, %s3081_s28 }
 0x1e8   : > { %625 = vrot.lane.b32.xlu2 %v4142_v61, %s3080_s21  ;;  %v1914_v61 = vld [vmem:[#allocation2 + $0x238] sm:$0xff] }
 0x1e9   : > { %v1705_v6 = vpop.permute.xlu1 %1704  ;;  %v1974_v44 = vpack.c.bf16 %v1914_v61, %v1911_v14 }
 0x1ea   : > { %1044 = vrot.lane.b32.xlu0 %v4228_v2, %s3081_s28  ;;  %v1524_v0 = vpop.permute.xlu2 %1523 }
 0x1eb   : > { %1593 = vst.msk [vmem:[#allocation2 + $0x200] sm:$0xff] %vm844_vm7, %v1524_v0  ;;  %2898 = vmatmul.msk.bf16.gmra.mxu2 %vm250_vm1, %v1974_v44  ;;  %v4406_v0 = vld [vmem:[%s3185_s9 + $0xf1] sm:$0xff] }
 0x1ec   : > { %v1703_v59 = vpop.permute.xlu0 %1702  ;;  %1773 = vst.msk [vmem:[#allocation2 + $0x200] sm:$0xff] %vm1086_vm6, %v1705_v6  ;;  %v2224_v5 = vpop.f32.mrf.mxu0 }
 0x1ed   : > { %1772 = vst.msk [vmem:[#allocation2 + $0x1e8] sm:$0xff] %vm1086_vm6, %v1703_v59  ;;  %v4408_v6 = vpop.f32.mrf.mxu2 }
 0x1ee   : > { %1841 = vst.msk [vmem:[#allocation2 + $0x2b0] sm:$0xff] %vm250_vm1, %v4406_v0 }
 0x1ef   : > { %1537 = vrot.lane.b32.xlu1 %v4349_v8, %s3082_s10 }
 0x1f1   : > { %v795_v17 = vpop.permute.xlu1 %794 }
 0x1f2   : > { %1304 = vrot.lane.b32.xlu0 %v1211_v63, %s3080_s21  ;;  %v614_v1 = vpop.permute.xlu2 %613  ;;  %v2754_v63 = vld [vmem:[%s3185_s9 + $0xf8] sm:$0x7f] }
 0x1f3   : > { %684 = vst.msk [vmem:[#allocation2 + $0x210] sm:$0xff] %vm663_vm2, %v614_v1  ;;  %v1907_v40 = vld [vmem:[#allocation2 + $0x200] sm:$0xff] }
 0x1f4   : > { %v616_v13 = vpop.permute.xlu0 %615  ;;  %v1904_v33 = vld [vmem:[#allocation2 + $0x1e8] sm:$0xff]  ;;  %866 = vst.msk [vmem:[#allocation2 + $0x210] sm:$0xff] %vm844_vm7, %v795_v17  ;;  %v4392_v46 = vpop.f32.mrf.mxu1 }
 0x1f5   : > { %685 = vst.msk [vmem:[#allocation2 + $0x228] sm:$0xff] %vm663_vm2, %v616_v13  ;;  %v1970_v54 = vpack.c.bf16 %v1907_v40, %v1904_v33  ;;  %v1479_v13 = vrot.slane %v2754_v63, 7  ;;  %v1213_v33 = vld [vmem:[%s3185_s9 + $0xf9] sm:$0x7f] }
 0x1f7   : > { %2330 = vmatmul.bf16.gmra.mxu1 %v1970_v54  ;;  %1720 = vrot.lane.b32.xlu1 %v4309_v4, %s3081_s28  ;;  %v721_v4 = vld [vmem:[%s3185_s9 + $0xd9] sm:$0x7f]  ;;  %v2405_v54 = vpop.f32.mrf.mxu2 }
 0x1f8   : > { %808 = vrot.lane.b32.xlu2 %v721_v4, %s3082_s10  ;;  %v370_v4 = vld [vmem:[%s3185_s9 + $0xc8] sm:$0x7f] }
 0x1f9   : > { %v1035_v32 = vpop.permute.xlu1 %1034 }
 0x1fa   : > { %1718 = vrot.lane.b32.xlu0 %v4289_v38, %s3081_s28  ;;  %v797_v28 = vpop.permute.xlu2 %796 }
 0x1fb   : > { %867 = vst.msk [vmem:[#allocation2 + $0x228] sm:$0x7f] %vm846_vm10, %v797_v28 }
 0x1fc   : > { %v1033_v38 = vpop.permute.xlu0 %1032  ;;  %1109 = vst.msk [vmem:[#allocation2 + $0x228] sm:$0xff] %vm1086_vm6, %v1035_v32  ;;  %v2313_v1 = vpop.f32.mrf.mxu1  ;;  %v2810_v32 = vld [vmem:[%s3185_s9 + $0xd9] sm:$0x7f] }
 0x1fd   : > { %1108 = vst.msk [vmem:[#allocation2 + $0x210] sm:$0xfe] %vm1084_vm3, %v1033_v38 }
 0x1fe   : > { %1838 = vst.msk [vmem:[#allocation2 + $0x268] sm:$0x7f] %vm1813_vm9, %v2810_v32 }
 0x1ff   : > { %810 = vrot.lane.b32.xlu1 %v4325_v29, %s3082_s10 }
 0x200   : > { %1302 = vrot.lane.b32.xlu2 %v4325_v29, %s3080_s21  ;;  %v1480_v29 = vsel %vm405_vm0, %v4349_v8, %v1479_v13 }
 0x201   : > { %v1526_v42 = vpop.permute.xlu1 %1525 }
 0x202   : > { %631 = vrot.lane.b32.xlu0 %v4242_v30, %s3080_s21  ;;  %v986_v30 = vrot.slane %v907_v45, 7  ;;  %v1291_v49 = vpop.permute.xlu2 %1290 }
 0x203   : > { %1365 = vst.msk [vmem:[#allocation2 + $0x218] sm:$0xff] %vm663_vm2, %v1291_v49  ;;  %v1912_v53 = vld [vmem:[#allocation2 + $0x228] sm:$0xff] }
 0x204   : > { %v1293_v26 = vpop.permute.xlu0 %1292  ;;  %v1909_v23 = vld [vmem:[#allocation2 + $0x210] sm:$0xff]  ;;  %1594 = vst.msk [vmem:[#allocation2 + $0x218] sm:$0xfe] %vm1571_vm4, %v1526_v42  ;;  %v987_v62 = vsel %vm405_vm0, %v4349_v8, %v986_v30  ;;  %v2227_v35 = vpop.f32.mrf.mxu0 }
 0x205   : > { %1366 = vst.msk [vmem:[#allocation2 + $0x230] sm:$0x7f] %vm1343_vm5, %v1293_v26  ;;  %v1972_v59 = vpack.c.bf16 %v1912_v53, %v1909_v23  ;;  %v4437_v26 = vld [vmem:[%s4649_s2] ss:$0 sm:$0xff]  ;;  %v2407_v42 = vpop.f32.mrf.mxu2 }
 0x206   : > { %v2228_v23 = vadd.f32 %v4437_v26, %v2227_v35  ;;  %v2225_v13 = vadd.f32 %v4437_v26, %v2224_v5 }
 0x207   : > { %2246 = vmatmul.bf16.gmra.mxu0 %v1972_v59  ;;  %1050 = vrot.lane.b32.xlu1 %v987_v62, %s3081_s28  ;;  %v1917_v59 = vld [vmem:[#allocation2 + $0x250] sm:$0xff] }
 0x208   : > { %1539 = vrot.lane.b32.xlu2 %v1480_v29, %s3082_s10  ;;  %v2314_v35 = vadd.f32 %v2313_v1, %v2225_v13  ;;  %v372_v13 = vld [vmem:[%s3185_s9 + $0xd8] sm:$0x7f] }
 0x209   : > { %v1709_v40 = vpop.permute.xlu1 %1708 }
 0x20a   : > { %1048 = vrot.lane.b32.xlu0 %v4349_v8, %s3081_s28  ;;  %v1528_v17 = vpop.permute.xlu2 %1527  ;;  %v443_v8 = vrot.slane %v370_v4, 7  ;;  %v2403_v1 = vadd.f32 %v4408_v6, %v2314_v35  ;;  %v2218_v6 = vadd.f32 %v4437_v26, %v4337_v58 }
 0x20b   : > { %1595 = vst.msk [vmem:[#allocation2 + $0x230] sm:$0xff] %vm844_vm7, %v1528_v17  ;;  %v723_v17 = vld [vmem:[%s3185_s9 + $0xe9] sm:$0x7f] }
 0x20c   : > { %v1707_v36 = vpop.permute.xlu0 %1706  ;;  %1775 = vst.msk [vmem:[#allocation2 + $0x230] sm:$0xff] %vm1086_vm6, %v1709_v40  ;;  %v2229_v44 = vpop.f32.mrf.mxu0  ;;  %v444_v45 = vsel %vm405_vm0, %v4076_v10, %v443_v8  ;;  %v2463_v8 = vmax.f32 %v2403_v1, 0.0 }
 0x20d   : > { %1774 = vst.msk [vmem:[#allocation2 + $0x218] sm:$0xff] %vm1086_vm6, %v1707_v36  ;;  %v2230_v30 = vadd.f32 %v4437_v26, %v2229_v44  ;;  %v1920_v36 = vld [vmem:[#allocation2 + $0x268] sm:$0xff] }
 0x20e   : > { %508 = vst.msk [vmem:[#allocation2 + $0x288] sm:$0xff] %vm250_vm1, %v444_v45  ;;  %v1977_v40 = vpack.c.bf16 %v1920_v36, %v1917_v59 }
 0x210   : > { %629 = vrot.lane.b32.xlu2 %v4214_v56, %s3080_s21  ;;  %2899 = vmatmul.msk.bf16.gmra.mxu2 %vm250_vm1, %v1977_v40 }
 0x211   : > { %v799_v28 = vpop.permute.xlu1 %798 }
 0x212   : > { %1308 = vrot.lane.b32.xlu0 %v1213_v33, %s3080_s21  ;;  %v618_v43 = vpop.permute.xlu2 %617 }
 0x213   : > { %686 = vst.msk [vmem:[#allocation2 + $0x240] sm:$0xff] %vm663_vm2, %v618_v43  ;;  %v1913_v14 = vld [vmem:[#allocation2 + $0x230] sm:$0xff] }
 0x214   : > { %v620_v39 = vpop.permute.xlu0 %619  ;;  %v1910_v20 = vld [vmem:[#allocation2 + $0x218] sm:$0xff]  ;;  %v2316_v38 = vpop.f32.mrf.mxu1  ;;  %868 = vst.msk [vmem:[#allocation2 + $0x240] sm:$0xff] %vm844_vm7, %v799_v28 }
 0x215   : > { %687 = vst.msk [vmem:[#allocation2 + $0x258] sm:$0xff] %vm663_vm2, %v620_v39  ;;  %v1973_v61 = vpack.c.bf16 %v1913_v14, %v1910_v20  ;;  %v2317_v56 = vadd.f32 %v2316_v38, %v2228_v23  ;;  %v2223_v20 = vadd.f32 %v4437_v26, %v4380_v21  ;;  %v2220_v21 = vadd.f32 %v4437_v26, %v4359_v15 }
 0x216   : > { %v2307_v15 = vadd.f32 %v4354_v34, %v2218_v6 }
 0x217   : > { %2335 = vmatmul.bf16.gmra.mxu1 %v1973_v61  ;;  %v2406_v29 = vadd.f32 %v2405_v54, %v2317_v56  ;;  %v2312_v5 = vadd.f32 %v4392_v46, %v2223_v20  ;;  %v2309_v4 = vadd.f32 %v4373_v3, %v2220_v21 }
 0x218   : > { %812 = vrot.lane.b32.xlu2 %v723_v17, %s3082_s10  ;;  %v2396_v58 = vadd.f32 %v4344_v41, %v2307_v15  ;;  %v446_v17 = vrot.slane %v372_v13, 7  ;;  %v2200_v15 = vadd.f32 %v4437_v26, %v4042_v18  ;;  %v2195_v18 = vadd.f32 %v4437_v26, %v3976_v60 }
 0x219   : > { %v1039_v62 = vpop.permute.xlu1 %1038  ;;  %v2464_v54 = vmax.f32 %v2406_v29, 0.0  ;;  %v2401_v46 = vadd.f32 %v4387_v12, %v2312_v5  ;;  %v2398_v23 = vadd.f32 %v4368_v48, %v2309_v4  ;;  %v2459_v29 = vmax.f32 %v4266_v50, 0.0  ;;  %v1923_v5 = vld [vmem:[#allocation2 + $0x280] sm:$0xff] }
 0x21a   : > { %v801_v53 = vpop.permute.xlu2 %800  ;;  %v447_v20 = vsel %vm405_vm0, %v4150_v51, %v446_v17  ;;  %v2458_v50 = vmax.f32 %v4248_v27, 0.0 }
 0x21b   : > { %869 = vst.msk [vmem:[#allocation2 + $0x258] sm:$0x7f] %vm846_vm10, %v801_v53  ;;  %v2462_v3 = vmax.f32 %v2401_v46, 0.0 }
 0x21c   : > { %v1037_v49 = vpop.permute.xlu0 %1036  ;;  %v2318_v10 = vpop.f32.mrf.mxu1  ;;  %1111 = vst.msk [vmem:[#allocation2 + $0x258] sm:$0xff] %vm1086_vm6, %v1039_v62 }
 0x21d   : > { %1110 = vst.msk [vmem:[#allocation2 + $0x240] sm:$0xfe] %vm1084_vm3, %v1037_v49  ;;  %v2319_v63 = vadd.f32 %v2318_v10, %v2230_v30  ;;  %v2461_v30 = vmax.f32 %v2398_v23, 0.0  ;;  %v2410_v49 = vpop.f32.mrf.mxu2  ;;  %v2460_v10 = vmax.f32 %v2396_v58, 0.0  ;;  %v2289_v23 = vadd.f32 %v4051_v24, %v2200_v15 }
 0x21e   : > { %510 = vst.msk [vmem:[#allocation2 + $0x2b8] sm:$0xff] %vm250_vm1, %v447_v20  ;;  %v1929_v20 = vld [vmem:[#allocation2 + $0x2b0] sm:$0xff] }
 0x21f   : > { %v2408_v33 = vadd.f32 %v2407_v42, %v2319_v63  ;;  %v2812_v63 = vld [vmem:[%s3185_s9 + $0xe9] sm:$0x7f] }
 0x220   : > { %1306 = vrot.lane.b32.xlu2 %v4406_v0, %s3080_s21  ;;  %1840 = vst.msk [vmem:[#allocation2 + $0x298] sm:$0x7f] %vm1813_vm9, %v2812_v63 }
 0x221   : > { %v2465_v39 = vmax.f32 %v2408_v33, 0.0  ;;  %v1530_v14 = vpop.permute.xlu1 %1529  ;;  %v2210_v33 = vadd.f32 %v4437_v26, %v4188_v31 }
 0x222   : > { %v1295_v28 = vpop.permute.xlu2 %1294 }
 0x223   : > { %2903 = vmatpush.xpose.msk.msra.mxu3 %vm250_vm1, %v2465_v39  ;;  %1367 = vst.msk [vmem:[#allocation2 + $0x248] sm:$0xff] %vm663_vm2, %v1295_v28  ;;  %v1918_v32 = vld [vmem:[#allocation2 + $0x258] sm:$0xff]  ;;  %v2299_v35 = vadd.f32 %v4203_v19, %v2210_v33 }
 0x224   : > { %v1297_v43 = vpop.permute.xlu0 %1296  ;;  %v1915_v38 = vld [vmem:[#allocation2 + $0x240] sm:$0xff]  ;;  %1596 = vst.msk [vmem:[#allocation2 + $0x248] sm:$0xfe] %vm1571_vm4, %v1530_v14  ;;  %v2232_v0 = vpop.f32.mrf.mxu0 }
 0x225   : > { %1368 = vst.msk [vmem:[#allocation2 + $0x260] sm:$0x7f] %vm1343_vm5, %v1297_v43  ;;  %v1975_v61 = vpack.c.bf16 %v1918_v32, %v1915_v38  ;;  %v2233_v48 = vadd.f32 %v4437_v26, %v2232_v0  ;;  %v2412_v28 = vpop.f32.mrf.mxu2  ;;  %v2388_v19 = vadd.f32 %v4216_v57, %v2299_v35  ;;  %v2205_v32 = vadd.f32 %v4437_v26, %v4119_v37 }
 0x226   : > { %v2456_v37 = vmax.f32 %v4154_v11, 0.0  ;;  %v2454_v0 = vmax.f32 %v4083_v22, 0.0 }
 0x227   : > { %2904 = vmatpush.xpose.msk.msra.mxu3 %vm250_vm1, %v2464_v54  ;;  %2251 = vmatmul.bf16.gmra.mxu0 %v1975_v61  ;;  %v1926_v14 = vld [vmem:[#allocation2 + $0x298] sm:$0xff]  ;;  %v2294_v57 = vadd.f32 %v4127_v25, %v2205_v32  ;;  %v2457_v4 = vmax.f32 %v2388_v19, 0.0  ;;  %v1935_v32 = vld [vmem:[#allocation2 + $0x2e0] sm:$0xff] }
 0x228   : > { %v1980_v61 = vpack.c.bf16 %v1926_v14, %v1923_v5 }
 0x229   : > { %v1713_v12 = vpop.permute.xlu1 %1712  ;;  %v2383_v6 = vadd.f32 %v4129_v52, %v2294_v57 }
 0x22a   : > { %v1532_v45 = vpop.permute.xlu2 %1531  ;;  %2900 = vmatmul.msk.bf16.gmra.mxu2 %vm250_vm1, %v1980_v61  ;;  %v1938_v61 = vld [vmem:[#allocation2 + $0x2f8] sm:$0xff] }
 0x22b   : > { %2905 = vmatpush.xpose.msk.msra.mxu3 %vm250_vm1, %v2463_v8  ;;  %1597 = vst.msk [vmem:[#allocation2 + $0x260] sm:$0xff] %vm844_vm7, %v1532_v45 }
 0x22c   : > { %v1711_v44 = vpop.permute.xlu0 %1710  ;;  %1777 = vst.msk [vmem:[#allocation2 + $0x260] sm:$0xff] %vm1086_vm6, %v1713_v12  ;;  %v2234_v39 = vpop.f32.mrf.mxu0  ;;  %v2378_v12 = vadd.f32 %v4058_v55, %v2289_v23 }
 0x22d   : > { %1776 = vst.msk [vmem:[#allocation2 + $0x248] sm:$0xff] %vm1086_vm6, %v1711_v44  ;;  %v2235_v43 = vadd.f32 %v4437_v26, %v2234_v39 }
 0x22f   : > { %2906 = vmatpush.xpose.msk.msra.mxu3 %vm250_vm1, %v2462_v3  ;;  %v2455_v3 = vmax.f32 %v2383_v6, 0.0 }
 0x231   : > { %v803_v59 = vpop.permute.xlu1 %802 }
 0x232   : > { %v622_v53 = vpop.permute.xlu2 %621 }
 0x233   : > { %2907 = vmatpush.xpose.msk.msra.mxu3 %vm250_vm1, %v2461_v30  ;;  %688 = vst.msk [vmem:[#allocation2 + $0x270] sm:$0xff] %vm663_vm2, %v622_v53  ;;  %v1919_v62 = vld [vmem:[#allocation2 + $0x260] sm:$0xff]  ;;  %v2284_v30 = vadd.f32 %v3984_v7, %v2195_v18  ;;  %v2452_v53 = vmax.f32 %v4045_v47, 0.0 }
 0x234   : > { %v624_v34 = vpop.permute.xlu0 %623  ;;  %v1916_v42 = vld [vmem:[#allocation2 + $0x248] sm:$0xff]  ;;  %v2321_v56 = vpop.f32.mrf.mxu1  ;;  %870 = vst.msk [vmem:[#allocation2 + $0x270] sm:$0xff] %vm844_vm7, %v803_v59 }
 0x235   : > { %689 = vst.msk [vmem:[#allocation2 + $0x288] sm:$0xff] %vm663_vm2, %v624_v34  ;;  %v2322_v41 = vadd.f32 %v2321_v56, %v2233_v48  ;;  %v1976_v36 = vpack.c.bf16 %v1919_v62, %v1916_v42  ;;  %v2415_v34 = vpop.f32.mrf.mxu2  ;;  %v2373_v60 = vadd.f32 %v4024_v16, %v2284_v30  ;;  %v2814_v56 = vld [vmem:[%s3185_s9 + $0xf9] sm:$0x7f] }
 0x236   : > { %1842 = vst.msk [vmem:[#allocation2 + $0x2c8] sm:$0x7f] %vm1813_vm9, %v2814_v56 }
 0x237   : > { %2908 = vmatpush.xpose.msk.msra.mxu3 %vm250_vm1, %v2460_v10  ;;  %v4484_v40 = vadd.f32 %v2410_v49, %v2322_v41  ;;  %2340 = vmatmul.bf16.gmra.mxu1 %v1976_v36  ;;  %v2453_v49 = vmax.f32 %v2378_v12, 0.0  ;;  %v374_v41 = vld [vmem:[%s3185_s9 + $0xe8] sm:$0x7f]  ;;  %v2451_v16 = vmax.f32 %v2373_v60, 0.0 }
 0x238   : > { %v449_v36 = vrot.slane %v374_v41, 7 }
 0x239   : > { %v1043_v1 = vpop.permute.xlu1 %1042 }
 0x23a   : > { %v805_v38 = vpop.permute.xlu2 %804  ;;  %v450_v33 = vsel %vm405_vm0, %v4228_v2, %v449_v36 }
 0x23b   : > { %2909 = vmatpush.xpose.msk.msra.mxu3 %vm250_vm1, %v2459_v29  ;;  %871 = vst.msk [vmem:[#allocation2 + $0x288] sm:$0x7f] %vm846_vm10, %v805_v38 }
 0x23c   : > { %v1041_v31 = vpop.permute.xlu0 %1040  ;;  %v2323_v51 = vpop.f32.mrf.mxu1  ;;  %1113 = vst.msk [vmem:[#allocation2 + $0x288] sm:$0xff] %vm1086_vm6, %v1043_v1 }
 0x23d   : > { %1112 = vst.msk [vmem:[#allocation2 + $0x270] sm:$0xfe] %vm1084_vm3, %v1041_v31  ;;  %v2324_v54 = vadd.f32 %v2323_v51, %v2235_v43  ;;  %v2417_v39 = vpop.f32.mrf.mxu2  ;;  %v2450_v31 = vmax.f32 %v3990_v9, 0.0 }
 0x23e   : > { %512 = vst.msk [vmem:[#allocation2 + $0x2e8] sm:$0xff] %vm250_vm1, %v450_v33 }
 0x23f   : > { %2910 = vmatpush.xpose.msk.msra.mxu3 %vm250_vm1, %v2458_v50  ;;  %v4501_v21 = vadd.f32 %v2412_v28, %v2324_v54  ;;  %v1932_v28 = vld [vmem:[#allocation2 + $0x2c8] sm:$0xff] }
 0x240   : > { %v1983_v5 = vpack.c.bf16 %v1932_v28, %v1929_v20 }
 0x241   : > { %v1534_v44 = vpop.permute.xlu1 %1533 }
 0x242   : > { %v1299_v8 = vpop.permute.xlu2 %1298  ;;  %2901 = vmatmul.msk.bf16.gmra.mxu2 %vm250_vm1, %v1983_v5 }
 0x243   : > { %2911 = vmatpush.xpose.msk.msra.mxu3 %vm250_vm1, %v2457_v4  ;;  %1369 = vst.msk [vmem:[#allocation2 + $0x278] sm:$0xff] %vm663_vm2, %v1299_v8  ;;  %v1924_v45 = vld [vmem:[#allocation2 + $0x288] sm:$0xff] }
 0x244   : > { %v1301_v27 = vpop.permute.xlu0 %1300  ;;  %v1921_v46 = vld [vmem:[#allocation2 + $0x270] sm:$0xff]  ;;  %1598 = vst.msk [vmem:[#allocation2 + $0x278] sm:$0xfe] %vm1571_vm4, %v1534_v44  ;;  %v2237_v24 = vpop.f32.mrf.mxu0 }
 0x245   : > { %1370 = vst.msk [vmem:[#allocation2 + $0x290] sm:$0x7f] %vm1343_vm5, %v1301_v27  ;;  %v1978_v25 = vpack.c.bf16 %v1924_v45, %v1921_v46  ;;  %v2238_v42 = vadd.f32 %v4437_v26, %v2237_v24  ;;  %v1986_v46 = vpack.c.bf16 %v1938_v61, %v1935_v32 }
 0x247   : > { %2912 = vmatpush.xpose.msk.msra.mxu3 %vm250_vm1, %v2456_v37  ;;  %2256 = vmatmul.bf16.gmra.mxu0 %v1978_v25 }
 0x249   : > { %v1717_v58 = vpop.permute.xlu1 %1716 }
 0x24a   : > { %v1536_v11 = vpop.permute.xlu2 %1535 }
 0x24b   : > { %2913 = vmatpush.xpose.msk.msra.mxu3 %vm250_vm1, %v2455_v3  ;;  %1599 = vst.msk [vmem:[#allocation2 + $0x290] sm:$0xff] %vm844_vm7, %v1536_v11  ;;  %v2420_v6 = vpop.f32.mrf.mxu2 }
 0x24c   : > { %v1715_v52 = vpop.permute.xlu0 %1714  ;;  %1779 = vst.msk [vmem:[#allocation2 + $0x290] sm:$0xff] %vm1086_vm6, %v1717_v58  ;;  %v2239_v47 = vpop.f32.mrf.mxu0 }
 0x24d   : > { %1778 = vst.msk [vmem:[#allocation2 + $0x278] sm:$0xff] %vm1086_vm6, %v1715_v52  ;;  %v2240_v35 = vadd.f32 %v4437_v26, %v2239_v47 }
 0x24f   : > { %2914 = vmatpush.xpose.msk.msra.mxu3 %vm250_vm1, %v2454_v0 }
 0x251   : > { %v807_v10 = vpop.permute.xlu1 %806 }
 0x252   : > { %v626_v48 = vpop.permute.xlu2 %625  ;;  %2902 = vmatmul.msk.bf16.gmra.mxu2 %vm250_vm1, %v1986_v46 }
 0x253   : > { %2915 = vmatpush.xpose.msk.msra.mxu3 %vm250_vm1, %v2453_v49  ;;  %690 = vst.msk [vmem:[#allocation2 + $0x2a0] sm:$0xff] %vm663_vm2, %v626_v48  ;;  %v1925_v59 = vld [vmem:[#allocation2 + $0x290] sm:$0xff]  ;;  %v2422_v30 = vpop.f32.mrf.mxu2 }
 0x254   : > { %v628_v55 = vpop.permute.xlu0 %627  ;;  %v1922_v22 = vld [vmem:[#allocation2 + $0x278] sm:$0xff]  ;;  %v2326_v7 = vpop.f32.mrf.mxu1  ;;  %872 = vst.msk [vmem:[#allocation2 + $0x2a0] sm:$0xff] %vm844_vm7, %v807_v10 }
 0x255   : > { %691 = vst.msk [vmem:[#allocation2 + $0x2b8] sm:$0xff] %vm663_vm2, %v628_v55  ;;  %v2327_v62 = vadd.f32 %v2326_v7, %v2238_v42  ;;  %v1979_v63 = vpack.c.bf16 %v1925_v59, %v1922_v22 }
 0x257   : > { %2916 = vmatpush.xpose.msk.msra.mxu3 %vm250_vm1, %v2452_v53  ;;  %v4536_v13 = vadd.f32 %v2415_v34, %v2327_v62  ;;  %2345 = vmatmul.bf16.gmra.mxu1 %v1979_v63 }
 0x259   : > { %v1047_v43 = vpop.permute.xlu1 %1046 }
 0x25a   : > { %v809_v29 = vpop.permute.xlu2 %808 }
 0x25b   : > { %2917 = vmatpush.xpose.msk.msra.mxu3 %vm250_vm1, %v2451_v16  ;;  %873 = vst.msk [vmem:[#allocation2 + $0x2b8] sm:$0x7f] %vm846_vm10, %v809_v29 }
 0x25c   : > { %v1045_v17 = vpop.permute.xlu0 %1044  ;;  %v2328_v38 = vpop.f32.mrf.mxu1  ;;  %1115 = vst.msk [vmem:[#allocation2 + $0x2b8] sm:$0xff] %vm1086_vm6, %v1047_v43 }
 0x25d   : > { %1114 = vst.msk [vmem:[#allocation2 + $0x2a0] sm:$0xfe] %vm1084_vm3, %v1045_v17  ;;  %v2329_v2 = vadd.f32 %v2328_v38, %v2240_v35 }
 0x25f   : > { %2918 = vmatpush.xpose.msk.msra.mxu3 %vm250_vm1, %v2450_v31  ;;  %v4548_v19 = vadd.f32 %v2417_v39, %v2329_v2 }
 0x261   : > { %v1538_v9 = vpop.permute.xlu1 %1537 }
 0x262   : > { %v1303_v51 = vpop.permute.xlu2 %1302 }
 0x263   : > { %1371 = vst.msk [vmem:[#allocation2 + $0x2a8] sm:$0xff] %vm663_vm2, %v1303_v51  ;;  %v1930_v54 = vld [vmem:[#allocation2 + $0x2b8] sm:$0xff] }
 0x264   : > { %v1305_v50 = vpop.permute.xlu0 %1304  ;;  %v1927_v1 = vld [vmem:[#allocation2 + $0x2a0] sm:$0xff]  ;;  %1600 = vst.msk [vmem:[#allocation2 + $0x2a8] sm:$0xfe] %vm1571_vm4, %v1538_v9  ;;  %v2242_v8 = vpop.f32.mrf.mxu0 }
 0x265   : > { %1372 = vst.msk [vmem:[#allocation2 + $0x2c0] sm:$0x7f] %vm1343_vm5, %v1305_v50  ;;  %v1981_v14 = vpack.c.bf16 %v1930_v54, %v1927_v1  ;;  %v2243_v45 = vadd.f32 %v4437_v26, %v2242_v8 }
 0x267   : > { %2261 = vmatmul.bf16.gmra.mxu0 %v1981_v14 }
 0x269   : > { %v1721_v27 = vpop.permute.xlu1 %1720 }
 0x26a   : > { %v1540_v4 = vpop.permute.xlu2 %1539 }
 0x26b   : > { %1601 = vst.msk [vmem:[#allocation2 + $0x2c0] sm:$0xff] %vm844_vm7, %v1540_v4 }
 0x26c   : > { %v1719_v57 = vpop.permute.xlu0 %1718  ;;  %1781 = vst.msk [vmem:[#allocation2 + $0x2c0] sm:$0xff] %vm1086_vm6, %v1721_v27  ;;  %v2244_v0 = vpop.f32.mrf.mxu0 }
 0x26d   : > { %1780 = vst.msk [vmem:[#allocation2 + $0x2a8] sm:$0xff] %vm1086_vm6, %v1719_v57  ;;  %v2245_v18 = vadd.f32 %v4437_v26, %v2244_v0 }
 0x26e   : > { %v2425_v63 = vpop.f32.mrf.mxu2 }
 0x271   : > { %v811_v15 = vpop.permute.xlu1 %810 }
 0x272   : > { %v630_v25 = vpop.permute.xlu2 %629 }
 0x273   : > { %692 = vst.msk [vmem:[#allocation2 + $0x2d0] sm:$0xff] %vm663_vm2, %v630_v25  ;;  %v1931_v3 = vld [vmem:[#allocation2 + $0x2c0] sm:$0xff] }
 0x274   : > { %v632_v37 = vpop.permute.xlu0 %631  ;;  %v1928_v44 = vld [vmem:[#allocation2 + $0x2a8] sm:$0xff]  ;;  %v2331_v23 = vpop.f32.mrf.mxu1  ;;  %874 = vst.msk [vmem:[#allocation2 + $0x2d0] sm:$0xff] %vm844_vm7, %v811_v15 }
 0x275   : > { %693 = vst.msk [vmem:[#allocation2 + $0x2e8] sm:$0xff] %vm663_vm2, %v632_v37  ;;  %v2332_v52 = vadd.f32 %v2331_v23, %v2243_v45  ;;  %v1982_v11 = vpack.c.bf16 %v1931_v3, %v1928_v44 }
 0x276   : > { %v2427_v29 = vpop.f32.mrf.mxu2 }
 0x277   : > { %v4562_v12 = vadd.f32 %v2420_v6, %v2332_v52  ;;  %2350 = vmatmul.bf16.gmra.mxu1 %v1982_v11 }
 0x279   : > { %v1051_v49 = vpop.permute.xlu1 %1050 }
 0x27a   : > { %v813_v24 = vpop.permute.xlu2 %812 }
 0x27b   : > { %875 = vst.msk [vmem:[#allocation2 + $0x2e8] sm:$0x7f] %vm846_vm10, %v813_v24 }
 0x27c   : > { %v1049_v58 = vpop.permute.xlu0 %1048  ;;  %v2333_v34 = vpop.f32.mrf.mxu1  ;;  %1117 = vst.msk [vmem:[#allocation2 + $0x2e8] sm:$0xff] %vm1086_vm6, %v1051_v49 }
 0x27d   : > { %1116 = vst.msk [vmem:[#allocation2 + $0x2d0] sm:$0xfe] %vm1084_vm3, %v1049_v58  ;;  %v2334_v55 = vadd.f32 %v2333_v34, %v2245_v18 }
 0x27f   : > { %v4568_v22 = vadd.f32 %v2422_v30, %v2334_v55 }
 0x282   : > { %v1307_v60 = vpop.permute.xlu2 %1306 }
 0x283   : > { %1373 = vst.msk [vmem:[#allocation2 + $0x2d8] sm:$0xff] %vm663_vm2, %v1307_v60  ;;  %v1936_v53 = vld [vmem:[#allocation2 + $0x2e8] sm:$0xff] }
 0x284   : > { %v1309_v42 = vpop.permute.xlu0 %1308  ;;  %v1933_v48 = vld [vmem:[#allocation2 + $0x2d0] sm:$0xff]  ;;  %v2247_v62 = vpop.f32.mrf.mxu0 }
 0x285   : > { %1374 = vst.msk [vmem:[#allocation2 + $0x2f0] sm:$0x7f] %vm1343_vm5, %v1309_v42  ;;  %v1984_v10 = vpack.c.bf16 %v1936_v53, %v1933_v48  ;;  %v2248_v41 = vadd.f32 %v4437_v26, %v2247_v62 }
 0x287   : > { %2266 = vmatmul.bf16.gmra.mxu0 %v1984_v10 }
 0x28a   : > { %v1934_v59 = vld [vmem:[#allocation2 + $0x2d8] sm:$0xff] }
 0x28c   : > { %v1937_v7 = vld [vmem:[#allocation2 + $0x2f0] sm:$0xff]  ;;  %v2249_v33 = vpop.f32.mrf.mxu0 }
 0x28d   : > { %v1985_v56 = vpack.c.bf16 %v1937_v7, %v1934_v59  ;;  %v2250_v17 = vadd.f32 %v4437_v26, %v2249_v33 }
 0x28f   : > { %2355 = vmatmul.bf16.gmra.mxu1 %v1985_v56 }
 0x293   : > { %v2430_v43 = vpop.f32.mrf.mxu2 }
 0x294   : > { %v2336_v36 = vpop.f32.mrf.mxu1 }
 0x295   : > { %v2337_v16 = vadd.f32 %v2336_v36, %v2248_v41 }
 0x297   : > { %v4573_v47 = vadd.f32 %v2425_v63, %v2337_v16 }
 0x29b   : > { %v2432_v9 = vpop.f32.mrf.mxu2 }
 0x29c   : > { %v2338_v35 = vpop.f32.mrf.mxu1 }
 0x29d   : > { %v2339_v39 = vadd.f32 %v2338_v35, %v2250_v17  ;;  %v2482_v17 = vld [vmem:[%s4650_s3] sm:$0xff] }
 0x29e   : > { %2919 = vmatmul.msk.f32.vlgmr.msra.gmra.mxu3 %vm250_vm1, %v2482_v17 }
 0x29f   : > { %v4576_v20 = vadd.f32 %v2427_v29, %v2339_v39 }
 0x2a4   : > { %v2252_v31 = vpop.f32.mrf.mxu0 }
 0x2a5   : > { %v2253_v38 = vadd.f32 %v4437_v26, %v2252_v31 }
 0x2ac   : > { %v2254_v50 = vpop.f32.mrf.mxu0 }
 0x2ad   : > { %v2255_v1 = vadd.f32 %v4437_v26, %v2254_v50  ;;  %v2435_v61 = vpop.f32.mrf.mxu2  ;;  %v2472_v50 = vmax.f32 %v4573_v47, 0.0  ;;  %v2468_v47 = vmax.f32 %v4536_v13, 0.0 }
 0x2b4   : > { %v2341_v2 = vpop.f32.mrf.mxu1 }
 0x2b5   : > { %v2342_v28 = vadd.f32 %v2341_v2, %v2253_v38  ;;  %v2437_v27 = vpop.f32.mrf.mxu2  ;;  %v3084_v38 = vmov 0   ;;  %v2473_v2 = vmax.f32 %v4576_v20, 0.0  ;;  %v2470_v20 = vmax.f32 %v4562_v12, 0.0 }
 0x2b6   : > { %3007 = vset.pattern.permute.xlu1 %v3084_v38  ;;  %3008 = vset.pattern.permute.xlu2 %v3084_v38 }
 0x2b7   : > { %v4579_v5 = vadd.f32 %v2430_v43, %v2342_v28  ;;  %3009 = vset.pattern.permute.xlu0 %v3084_v38  ;;  %v2484_v28 = vld [vmem:[%s4651_s4] sm:$0xff] }
 0x2b8   : > { %2488 = vperm.xlu1 %3007, %v2484_v28  }
 0x2b9   : > { %v2474_v43 = vmax.f32 %v4579_v5, 0.0  ;;  %v2471_v5 = vmax.f32 %v4568_v22, 0.0  ;;  %v2467_v22 = vmax.f32 %v4501_v21, 0.0 }
 0x2bc   : > { %v2343_v51 = vpop.f32.mrf.mxu1 }
 0x2bd   : > { %v2344_v54 = vadd.f32 %v2343_v51, %v2255_v1  ;;  %v2485_v1 = vld [vmem:[%s4651_s4 + $0x8] sm:$0x7f]  ;;  %v2469_v51 = vmax.f32 %v4548_v19, 0.0 }
 0x2be   : > { %2493 = vperm.xlu2 %3008, %v2485_v1  }
 0x2bf   : > { %v2433_v14 = vadd.f32 %v2432_v9, %v2344_v54  ;;  %v2466_v9 = vmax.f32 %v4484_v40, 0.0 }
 0x2c1   : > { %v2475_v31 = vmax.f32 %v2433_v14, 0.0 }
 0x2c4   : > { %v2257_v32 = vpop.f32.mrf.mxu0 }
 0x2c5   : > { %v2440_v6 = vpop.f32.mrf.mxu2  ;;  %v2258_v41 = vadd.f32 %v4437_v26, %v2257_v32 }
 0x2cc   : > { %v2259_v4 = vpop.f32.mrf.mxu0 }
 0x2cd   : > { %v2442_v45 = vpop.f32.mrf.mxu2  ;;  %v2260_v59 = vadd.f32 %v4437_v26, %v2259_v4 }
 0x2d4   : > { %v2346_v57 = vpop.f32.mrf.mxu1 }
 0x2d5   : > { %v2445_v23 = vpop.f32.mrf.mxu2  ;;  %v2347_v36 = vadd.f32 %v2346_v57, %v2258_v41 }
 0x2d7   : > { %v2436_v35 = vadd.f32 %v2435_v61, %v2347_v36 }
 0x2d9   : > { %v2476_v39 = vmax.f32 %v2436_v35, 0.0 }
 0x2dc   : > { %v2348_v46 = vpop.f32.mrf.mxu1 }
 0x2dd   : > { %v2447_v30 = vpop.f32.mrf.mxu2  ;;  %v2349_v56 = vadd.f32 %v2348_v46, %v2260_v59 }
 0x2df   : > { %v2438_v16 = vadd.f32 %v2437_v27, %v2349_v56 }
 0x2e1   : > { %v2477_v29 = vmax.f32 %v2438_v16, 0.0 }
 0x2e4   : > { %v2262_v8 = vpop.f32.mrf.mxu0 }
 0x2e5   : > { %v2263_v60 = vadd.f32 %v4437_v26, %v2262_v8 }
 0x2ec   : > { %v2264_v44 = vpop.f32.mrf.mxu0 }
 0x2ed   : > { %v2265_v49 = vadd.f32 %v4437_v26, %v2264_v44 }
 0x2f4   : > { %v2351_v37 = vpop.f32.mrf.mxu1 }
 0x2f5   : > { %v2352_v53 = vadd.f32 %v2351_v37, %v2263_v60 }
 0x2f7   : > { %v2441_v62 = vadd.f32 %v2440_v6, %v2352_v53 }
 0x2f9   : > { %v2478_v33 = vmax.f32 %v2441_v62, 0.0 }
 0x2fc   : > { %v2353_v25 = vpop.f32.mrf.mxu1 }
 0x2fd   : > { %v2354_v55 = vadd.f32 %v2353_v25, %v2265_v49 }
 0x2ff   : > { %v2443_v10 = vadd.f32 %v2442_v45, %v2354_v55 }
 0x301   : > { %v2479_v63 = vmax.f32 %v2443_v10, 0.0 }
 0x304   : > { %v2267_v15 = vpop.f32.mrf.mxu0 }
 0x305   : > { %v2268_v11 = vadd.f32 %v4437_v26, %v2267_v15 }
 0x30c   : > { %v2356_v3 = vpop.f32.mrf.mxu1  ;;  %v2269_v52 = vpop.f32.mrf.mxu0 }
 0x30d   : > { %v2270_v0 = vadd.f32 %v4437_v26, %v2269_v52  ;;  %v2357_v18 = vadd.f32 %v2356_v3, %v2268_v11  ;;  %v2483_v26 = vld [vmem:[%s4650_s3 + $0x8] sm:$0x7f] }
 0x30e   : > { %2920 = vmatmul.msk.f32.gmra.mxu3 %vm250_vm1, %v2483_v26 }
 0x30f   : > { %v2446_v42 = vadd.f32 %v2445_v23, %v2357_v18 }
 0x311   : > { %v2480_v7 = vmax.f32 %v2446_v42, 0.0 }
 0x314   : > { %v2358_v58 = vpop.f32.mrf.mxu1 }
 0x315   : > { %v2359_v24 = vadd.f32 %v2358_v58, %v2270_v0 }
 0x317   : > { %v2448_v34 = vadd.f32 %v2447_v30, %v2359_v24 }
 0x318   : > { %v2494_v13 = vpop.permute.xlu2 %2493 }
 0x319   : > { %v2481_v48 = vmax.f32 %v2448_v34, 0.0 }
 0x31b   : > { %2921 = vmatpush.xpose.msk.msrb.mxu3 %vm250_vm1, %v2481_v48 }
 0x31f   : > { %2922 = vmatpush.xpose.msk.msrb.mxu3 %vm250_vm1, %v2480_v7 }
 0x321   : > { %v2615_v19 = vpop.f32.mrf.mxu3 }
 0x323   : > { %2923 = vmatpush.xpose.msk.msrb.mxu3 %vm250_vm1, %v2479_v63 }
 0x327   : > { %2924 = vmatpush.xpose.msk.msrb.mxu3 %vm250_vm1, %v2478_v33 }
 0x32a   : > { %v2489_v12 = vpop.permute.xlu1 %2488 }
 0x32b   : > { %2925 = vmatpush.xpose.msk.msrb.mxu3 %vm250_vm1, %v2477_v29  ;;  %v2616_v21 = vadd.f32 %v2615_v19, %v2489_v12 }
 0x32d   : > { %2644 = vst [vmem:[%s246_s8] sm:$0xff] %v2616_v21 }
 0x32f   : > { %2926 = vmatpush.xpose.msk.msrb.mxu3 %vm250_vm1, %v2476_v39 }
 0x333   : > { %2927 = vmatpush.xpose.msk.msrb.mxu3 %vm250_vm1, %v2475_v31 }
 0x337   : > { %2928 = vmatpush.xpose.msk.msrb.mxu3 %vm250_vm1, %v2474_v43 }
 0x33b   : > { %2929 = vmatpush.xpose.msk.msrb.mxu3 %vm250_vm1, %v2473_v2 }
 0x33f   : > { %2930 = vmatpush.xpose.msk.msrb.mxu3 %vm250_vm1, %v2472_v50 }
 0x343   : > { %2931 = vmatpush.xpose.msk.msrb.mxu3 %vm250_vm1, %v2471_v5 }
 0x347   : > { %2932 = vmatpush.xpose.msk.msrb.mxu3 %vm250_vm1, %v2470_v20 }
 0x34b   : > { %2933 = vmatpush.xpose.msk.msrb.mxu3 %vm250_vm1, %v2469_v51 }
 0x34f   : > { %2934 = vmatpush.xpose.msk.msrb.mxu3 %vm250_vm1, %v2468_v47 }
 0x353   : > { %2935 = vmatpush.xpose.msk.msrb.mxu3 %vm250_vm1, %v2467_v22 }
 0x357   : > { %2936 = vmatpush.xpose.msk.msrb.mxu3 %vm250_vm1, %v2466_v9 }
 0x35a   : > { %2937 = vmatmul.msk.f32.vlgmr.msrb.gmra.mxu3 %vm250_vm1, %v2482_v17 }
 0x362   : > { %2938 = vmatmul.msk.f32.gmra.mxu3 %vm250_vm1, %v2483_v26 }
 0x391   : > { %v2618_v54 = vpop.f32.mrf.mxu3 }
 0x392   : > { %v2619_v40 = vadd.f32 %v2618_v54, %v2494_v13 }
 0x394   : > { %2646 = vst [vmem:[%s246_s8 + $0x10] sm:$0x7f] %v2619_v40 }
 0x3dd   : > { %v2638_v14 = vpop.f32.mrf.mxu3 }
 0x3de   : > { %v2639_v32 = vadd.f32 %v2638_v14, %v2489_v12 }
 0x3e0   : > { %2645 = vst [vmem:[%s246_s8 + $0x8] sm:$0xff] %v2639_v32 }
 0x3e5   : > { %v2641_v61 = vpop.f32.mrf.mxu3 }
 0x3e6   : > { %v2642_v57 = vadd.f32 %v2641_v61, %v2494_v13 }
 0x3e8   : > { %2647 = vst [vmem:[%s246_s8 + $0x18] sm:$0x7f] %v2642_v57 }
 0x3e9 PF: > { %p15_p7 = scmp.ge.s32.totalorder %s3137_s23, 4   ;;  %s4656_s18 = smov %s3068_s19 }
 0x3ea   : > { %s4657_s19 = smov %s3072_s20  ;;  %s4658_s20 = smov %s3147_s26 }
 0x3eb   : > { %s4659_s21 = smov %s3137_s23  ;;  %17 = sbr.rel (!%p15_p7) target bundleno = 3 (0x3), region = 82 }
 0x3f0   :  { %2669 = vsyncpa [#allocation4], 1 }
 0x3f1   :  { %2671 = vsyncpa [#allocation4 + $0x1], 1 }

</bundles_post_ra>
